<compile_context>
chip_gen: v5e
topology: v5e:2x2
jax: 0.10.0
libtpu: 0.0.40
codegen_flags: <defaults>
</compile_context>

<pallas_src>
import jax
import jax.numpy as jnp
from jax import lax
from jax.experimental import pallas as pl
from jax.experimental.pallas import tpu as pltpu


def _sigmoid(z):
    # exact identity sigmoid(z) = 0.5*(tanh(z/2)+1) — same formulation as the kernel
    return 0.5 * (jnp.tanh(0.5 * z) + 1.0)


def _fused_bilstm_kernel(x_ref, wih_ref, b_ref, whh_ref, wpf_ref, wpb_ref, bp_ref,
                         out_ref, gpre_ref, hf_ref, hb_ref):
    """Fused bidirectional LSTM + Linear(2H -> D), single invocation.

    x_ref    : (S*B, D)   time-major flattened input
    wih_ref  : (D, 8H)    input->gate weights, cols = [i_f|i_b|f_f|f_b|g_f|g_b|o_f|o_b]
    b_ref    : (1, 8H)    b_ih + b_hh, same column layout
    whh_ref  : (2H, 8H)   block-diagonal recurrent weights (rows = [h_f | h_b])
    wpf/wpb  : (H, D)     projection weight halves; bp_ref: (1, D) projection bias
    out_ref  : (S, B, D)  output (time-major)
    gpre_ref : (S*B, 8H)  scratch: hoisted input-projection gate pre-activations
    hf_ref   : (S, B, H)  scratch: forward hidden sequence (time-aligned)
    hb_ref   : (S, B, H)  scratch: backward hidden sequence (time-aligned)
    """
    S, B, _ = out_ref.shape
    H2 = whh_ref.shape[0]          # 2H
    H = H2 // 2
    G = whh_ref.shape[1]           # 8H

    # ---- prologue: hoisted input projection (all timesteps, both directions) -----
    gpre_ref[...] = (jnp.dot(x_ref[...], wih_ref[...],
                             preferred_element_type=jnp.float32) + b_ref[...])

    # Lane-constant selectors (built once, loop-invariant).
    col = lax.broadcasted_iota(jnp.int32, (1, G), 1)
    fwd_cols = (col % H2) < H                       # fwd lanes within each gate block
    is_cell = (col >= 2 * H2) & (col < 3 * H2)      # "g" gate -> tanh, others sigmoid
    scale = jnp.where(is_cell, 1.0, 0.5)
    alpha = jnp.where(is_cell, 1.0, 0.5)
    beta = jnp.where(is_cell, 0.0, 0.5)

    # ---- serial recurrence: one (B, 2H) @ (2H, 8H) MXU push per step -------------
    def step(t, carry):
        h, c = carry                                # (B, 2H) each, lanes = [fwd | bwd]
        z = jnp.dot(h, whh_ref[...], preferred_element_type=jnp.float32)   # (B, 8H)
        g_fwd = gpre_ref[pl.ds(t * B, B), :]            # pre-acts at fwd time t
        g_bwd = gpre_ref[pl.ds((S - 1 - t) * B, B), :]  # pre-acts at bwd time S-1-t
        z = z + jnp.where(fwd_cols, g_fwd, g_bwd)
        # sigmoid(i,f,o) and tanh(g) in a single EUP pass
        a = jnp.tanh(z * scale) * alpha + beta
        i_g = a[:, 0 * H2:1 * H2]
        f_g = a[:, 1 * H2:2 * H2]
        g_g = a[:, 2 * H2:3 * H2]
        o_g = a[:, 3 * H2:4 * H2]
        c_new = f_g * c + i_g * g_g                 # (B, 2H) = [c_f | c_b]
        h_new = o_g * jnp.tanh(c_new)               # (B, 2H) = [h_f | h_b]
        hf_ref[t] = h_new[:, :H]
        hb_ref[S - 1 - t] = h_new[:, H:]
        return h_new, c_new

    zeros = jnp.zeros((B, H2), jnp.float32)
    lax.fori_loop(0, S, step, (zeros, zeros), unroll=min(S, 8))

    # ---- epilogue: fused Linear(2H -> D) on the VMEM-resident hidden states ------
    def proj(t, carry):
        y = (jnp.dot(hf_ref[t], wpf_ref[...], preferred_element_type=jnp.float32)
             + jnp.dot(hb_ref[t], wpb_ref[...], preferred_element_type=jnp.float32)
             + bp_ref[...])
        out_ref[t] = y.astype(out_ref.dtype)
        return carry

    lax.fori_loop(0, S, proj, 0, unroll=min(S, 8))


def _repack_params(params, H):
    """Repack PyTorch nn.LSTM / nn.Linear weights into the fused-kernel layout."""
    f32 = jnp.float32

    def gate_rows(w, q):        # gate q rows of a PyTorch (4H, in) matrix -> (in, H)
        return w[q * H:(q + 1) * H, :].T.astype(f32)

    b_f = (params["b_ih_f"] + params["b_hh_f"]).astype(f32)
    b_b = (params["b_ih_b"] + params["b_hh_b"]).astype(f32)

    wih_cols, whh_cols, b_cols = [], [], []
    zero = jnp.zeros((H, H), f32)
    for q in range(4):          # PyTorch gate order: i, f, g(cell), o
        wih_cols += [gate_rows(params["w_ih_f"], q), gate_rows(params["w_ih_b"], q)]
        b_cols += [b_f[q * H:(q + 1) * H], b_b[q * H:(q + 1) * H]]
        whh_cols.append(jnp.concatenate([
            jnp.concatenate([gate_rows(params["w_hh_f"], q), zero], axis=1),
            jnp.concatenate([zero, gate_rows(params["w_hh_b"], q)], axis=1),
        ], axis=0))                                        # (2H, 2H) block-diagonal
    wih_comb = jnp.concatenate(wih_cols, axis=1)           # (D, 8H)
    whh_comb = jnp.concatenate(whh_cols, axis=1)           # (2H, 8H)
    b_comb = jnp.concatenate(b_cols).reshape(1, 8 * H)     # (1, 8H)

    wp = params["proj_w"].astype(f32)                      # (D, 2H)
    wpf = wp[:, :H].T                                      # (H, D)  forward half
    wpb = wp[:, H:].T                                      # (H, D)  backward half
    bp = params["proj_b"].reshape(1, -1).astype(f32)       # (1, D)
    return wih_comb, b_comb, whh_comb, wpf, wpb, bp


def single_rnn_forward(x, params):
    """x: (B, S, D) float32; params in PyTorch nn.LSTM / nn.Linear layout.
    Returns (B, S, D), matching SingleRNN.forward (batch_first, bidirectional)."""
    B, S, D = x.shape
    H = params["w_hh_f"].shape[1]
    wih_comb, b_comb, whh_comb, wpf, wpb, bp = _repack_params(params, H)

    # time-major + flattened so the hoisted input projection is one big matmul
    x_flat = jnp.transpose(x, (1, 0, 2)).reshape(S * B, D).astype(jnp.float32)

    cost = pl.CostEstimate(
        flops=2 * S * B * (D * 8 * H + 2 * H * 8 * H + 2 * H * D),
        transcendentals=S * B * 10 * H,
        bytes_accessed=4 * (2 * S * B * D + D * 8 * H + 2 * H * 8 * H
                            + 8 * H + 2 * H * D + D),
    )

    # TODO(synk): for long sequences, chunk the time axis (VMEM residency is
    #             ~ 4*S*B*(D + 8H + 2H) bytes + weights); S=8 fits trivially here.
    out_sbd = pl.pallas_call(
        _fused_bilstm_kernel,
        out_shape=jax.ShapeDtypeStruct((S, B, D), jnp.float32),
        scratch_shapes=[
            pltpu.VMEM((S * B, 8 * H), jnp.float32),   # hoisted gate pre-activations
            pltpu.VMEM((S, B, H), jnp.float32),        # forward hidden sequence
            pltpu.VMEM((S, B, H), jnp.float32),        # backward hidden sequence
        ],
        cost_estimate=cost,
    )(x_flat, wih_comb, b_comb, whh_comb, wpf, wpb, bp)

    return jnp.transpose(out_sbd, (1, 0, 2))               # back to (B, S, D)


# ------------------------------- pure-JAX reference ---------------------------------
def _lstm_direction_ref(x, w_ih, w_hh, b_ih, b_hh, reverse):
    B, S, D = x.shape
    H = w_hh.shape[1]
    xs = jnp.transpose(x, (1, 0, 2))                 # (S, B, D)
    if reverse:
        xs = xs[::-1]

    def cell(carry, x_t):
        h, c = carry
        z = x_t @ w_ih.T + h @ w_hh.T + b_ih + b_hh  # (B, 4H), gate order i,f,g,o
        i = _sigmoid(z[:, :H])
        f = _sigmoid(z[:, H:2 * H])
        g = jnp.tanh(z[:, 2 * H:3 * H])
        o = _sigmoid(z[:, 3 * H:])
        c = f * c + i * g
        h = o * jnp.tanh(c)
        return (h, c), h

    init = (jnp.zeros((B, H), jnp.float32), jnp.zeros((B, H), jnp.float32))
    _, hs = lax.scan(cell, init, xs)
    if reverse:
        hs = hs[::-1]
    return jnp.transpose(hs, (1, 0, 2))              # (B, S, H)


def single_rnn_reference(x, p):
    hf = _lstm_direction_ref(x, p["w_ih_f"], p["w_hh_f"], p["b_ih_f"], p["b_hh_f"], False)
    hb = _lstm_direction_ref(x, p["w_ih_b"], p["w_hh_b"], p["b_ih_b"], p["b_hh_b"], True)
    cat = jnp.concatenate([hf, hb], axis=-1)         # (B, S, 2H)
    return cat @ p["proj_w"].T + p["proj_b"]


if __name__ == "__main__":
    # Small shapes consistent with SingleRNN(rnn_type="LSTM", input_size, hidden_size).
    B, S = 2, 8
    INPUT_SIZE, HIDDEN = 16, 32

    key = jax.random.PRNGKey(0)
    keys = jax.random.split(key, 11)

    def u(k, shape, bound):
        return jax.random.uniform(k, shape, jnp.float32, -bound, bound)

    kb = 1.0 / (HIDDEN ** 0.5)            # PyTorch LSTM init bound
    pb = 1.0 / ((2 * HIDDEN) ** 0.5)      # PyTorch Linear init bound
    params = dict(
        w_ih_f=u(keys[0], (4 * HIDDEN, INPUT_SIZE), kb),
        w_hh_f=u(keys[1], (4 * HIDDEN, HIDDEN), kb),
        b_ih_f=u(keys[2], (4 * HIDDEN,), kb),
        b_hh_f=u(keys[3], (4 * HIDDEN,), kb),
        w_ih_b=u(keys[4], (4 * HIDDEN, INPUT_SIZE), kb),
        w_hh_b=u(keys[5], (4 * HIDDEN, HIDDEN), kb),
        b_ih_b=u(keys[6], (4 * HIDDEN,), kb),
        b_hh_b=u(keys[7], (4 * HIDDEN,), kb),
        proj_w=u(keys[8], (INPUT_SIZE, 2 * HIDDEN), pb),
        proj_b=u(keys[9], (INPUT_SIZE,), pb),
    )
    x = jax.random.normal(keys[10], (B, S, INPUT_SIZE), jnp.float32)

    out = jax.jit(single_rnn_forward)(x, params)
    out = jax.block_until_ready(out)

    ref = single_rnn_reference(x, params)
    assert out.shape == (B, S, INPUT_SIZE), out.shape
    max_err = float(jnp.max(jnp.abs(out - ref)))
    assert max_err < 1e-3, max_err
    print("KERNEL_OK")
</pallas_src>

<mosaic_0001>
module attributes {stable_mosaic.version = 11 : i64} {
  func.func @_fused_bilstm_kernel(%arg0: memref<16x16xf32, #tpu.memory_space<vmem>>, %arg1: memref<16x256xf32, #tpu.memory_space<vmem>>, %arg2: memref<1x256xf32, #tpu.memory_space<vmem>>, %arg3: memref<64x256xf32, #tpu.memory_space<vmem>>, %arg4: memref<32x16xf32, #tpu.memory_space<vmem>>, %arg5: memref<32x16xf32, #tpu.memory_space<vmem>>, %arg6: memref<1x16xf32, #tpu.memory_space<vmem>>, %arg7: memref<8x2x16xf32, #tpu.memory_space<vmem>>, %arg8: memref<16x256xf32, #tpu.memory_space<vmem>>, %arg9: memref<8x2x32xf32, #tpu.memory_space<vmem>>, %arg10: memref<8x2x32xf32, #tpu.memory_space<vmem>>) attributes {dimension_semantics = [], scalar_prefetch = 0 : i64, scratch_operands = 3 : i64, tpu.core_type = #tpu.core_type<tc>} {
    %c0 = arith.constant 0 : index
    %c0_0 = arith.constant 0 : index
    %0 = vector.load %arg0[%c0, %c0_0] : memref<16x16xf32, #tpu.memory_space<vmem>>, vector<16x16xf32>
    %c0_1 = arith.constant 0 : index
    %c0_2 = arith.constant 0 : index
    %1 = vector.load %arg1[%c0_1, %c0_2] : memref<16x256xf32, #tpu.memory_space<vmem>>, vector<16x256xf32>
    %cst = arith.constant dense<0.000000e+00> : vector<16x256xf32>
    %2 = tpu.matmul %0, %1, %cst {dimension_numbers = #tpu.dot_dimension_numbers<[1], [0], [0], [1], [0, 0, 1, 1], [], []>} : vector<16x16xf32>, vector<16x256xf32>, vector<16x256xf32> -> vector<16x256xf32>
    %c0_3 = arith.constant 0 : index
    %c0_4 = arith.constant 0 : index
    %3 = vector.load %arg2[%c0_3, %c0_4] : memref<1x256xf32, #tpu.memory_space<vmem>>, vector<1x256xf32>
    %4 = vector.broadcast %3 : vector<1x256xf32> to vector<16x256xf32>
    %5 = arith.addf %2, %4 : vector<16x256xf32>
    %c0_5 = arith.constant 0 : index
    %c0_6 = arith.constant 0 : index
    %6 = vector.load %arg8[%c0_5, %c0_6] : memref<16x256xf32, #tpu.memory_space<vmem>>, vector<16x256xf32>
    tpu.vector_store %arg8[%c0_5, %c0_6], %5 {strides = array<i32>} : memref<16x256xf32, #tpu.memory_space<vmem>>, vector<16x256xf32>,
    %7 = tpu.iota {dimensions = array<i32: 1>} : vector<1x256xi32>
    %c64_i32 = arith.constant 64 : i32
    %c0_i32 = arith.constant 0 : i32
    %8 = arith.cmpi eq, %c64_i32, %c0_i32 : i32
    %c1_i32 = arith.constant 1 : i32
    %9 = arith.select %8, %c1_i32, %c64_i32 : i32
    %10 = vector.broadcast %9 : i32 to vector<1x256xi32>
    %11 = arith.remsi %7, %10 : vector<1x256xi32>
    %c0_i32_7 = arith.constant 0 : i32
    %12 = vector.broadcast %c0_i32_7 : i32 to vector<1x256xi32>
    %13 = arith.cmpi ne, %11, %12 : vector<1x256xi32>
    %c0_i32_8 = arith.constant 0 : i32
    %14 = vector.broadcast %c0_i32_8 : i32 to vector<1x256xi32>
    %15 = arith.cmpi slt, %11, %14 : vector<1x256xi32>
    %c0_i32_9 = arith.constant 0 : i32
    %16 = arith.cmpi slt, %9, %c0_i32_9 : i32
    %17 = vector.broadcast %16 : i1 to vector<1x256xi1>
    %18 = vector.broadcast %17 : vector<1x256xi1> to vector<1x256xi1>
    %19 = arith.xori %15, %18 : vector<1x256xi1>
    %20 = arith.andi %19, %13 : vector<1x256xi1>
    %21 = vector.broadcast %9 : i32 to vector<1x256xi32>
    %22 = arith.addi %11, %21 : vector<1x256xi32>
    %23 = arith.select %20, %22, %11 : vector<1x256xi1>, vector<1x256xi32>
    %c32_i32 = arith.constant 32 : i32
    %24 = vector.broadcast %c32_i32 : i32 to vector<1x256xi32>
    %25 = arith.cmpi slt, %23, %24 : vector<1x256xi32>
    %c128_i32 = arith.constant 128 : i32
    %26 = vector.broadcast %c128_i32 : i32 to vector<1x256xi32>
    %27 = arith.cmpi sge, %7, %26 : vector<1x256xi32>
    %c192_i32 = arith.constant 192 : i32
    %28 = vector.broadcast %c192_i32 : i32 to vector<1x256xi32>
    %29 = arith.cmpi slt, %7, %28 : vector<1x256xi32>
    %30 = arith.andi %27, %29 : vector<1x256xi1>
    %cst_10 = arith.constant 1.000000e+00 : f32
    %cst_11 = arith.constant 5.000000e-01 : f32
    %31 = vector.broadcast %cst_10 : f32 to vector<1x256xf32>
    %32 = vector.broadcast %cst_11 : f32 to vector<1x256xf32>
    %33 = arith.select %30, %31, %32 : vector<1x256xi1>, vector<1x256xf32>
    %cst_12 = arith.constant 1.000000e+00 : f32
    %cst_13 = arith.constant 5.000000e-01 : f32
    %34 = vector.broadcast %cst_12 : f32 to vector<1x256xf32>
    %35 = vector.broadcast %cst_13 : f32 to vector<1x256xf32>
    %36 = arith.select %30, %34, %35 : vector<1x256xi1>, vector<1x256xf32>
    %cst_14 = arith.constant 0.000000e+00 : f32
    %cst_15 = arith.constant 5.000000e-01 : f32
    %37 = vector.broadcast %cst_14 : f32 to vector<1x256xf32>
    %38 = vector.broadcast %cst_15 : f32 to vector<1x256xf32>
    %39 = arith.select %30, %37, %38 : vector<1x256xi1>, vector<1x256xf32>
    %cst_16 = arith.constant 0.000000e+00 : f32
    %40 = vector.broadcast %cst_16 : f32 to vector<2x64xf32>
    %c0_i32_17 = arith.constant 0 : i32
    %c0_18 = arith.constant 0 : index
    %c0_19 = arith.constant 0 : index
    %41 = vector.load %arg3[%c0_18, %c0_19] : memref<64x256xf32, #tpu.memory_space<vmem>>, vector<64x256xf32>
    %cst_20 = arith.constant dense<0.000000e+00> : vector<2x256xf32>
    %42 = tpu.matmul %40, %41, %cst_20 {dimension_numbers = #tpu.dot_dimension_numbers<[1], [0], [0], [1], [0, 0, 1, 1], [], []>} : vector<2x64xf32>, vector<64x256xf32>, vector<2x256xf32> -> vector<2x256xf32>
    %c2_i32 = arith.constant 2 : i32
    %43 = arith.muli %c0_i32_17, %c2_i32 : i32
    %44 = arith.index_cast %43 : i32 to index
    %c0_21 = arith.constant 0 : index
    %45 = vector.load %arg8[%44, %c0_21] : memref<16x256xf32, #tpu.memory_space<vmem>>, vector<2x256xf32>
    %c7_i32 = arith.constant 7 : i32
    %46 = arith.subi %c7_i32, %c0_i32_17 : i32
    %c2_i32_22 = arith.constant 2 : i32
    %47 = arith.muli %46, %c2_i32_22 : i32
    %48 = arith.index_cast %47 : i32 to index
    %c0_23 = arith.constant 0 : index
    %49 = vector.load %arg8[%48, %c0_23] : memref<16x256xf32, #tpu.memory_space<vmem>>, vector<2x256xf32>
    %50 = vector.shape_cast %25 : vector<1x256xi1> to vector<1x256xi1>
    %51 = vector.broadcast %50 : vector<1x256xi1> to vector<2x256xi1>
    %52 = arith.select %51, %45, %49 : vector<2x256xi1>, vector<2x256xf32>
    %53 = arith.addf %42, %52 : vector<2x256xf32>
    %54 = vector.broadcast %33 : vector<1x256xf32> to vector<2x256xf32>
    %55 = arith.mulf %53, %54 : vector<2x256xf32>
    %56 = math.tanh %55 : vector<2x256xf32>
    %57 = vector.broadcast %36 : vector<1x256xf32> to vector<2x256xf32>
    %58 = arith.mulf %56, %57 : vector<2x256xf32>
    %59 = vector.broadcast %39 : vector<1x256xf32> to vector<2x256xf32>
    %60 = arith.addf %58, %59 : vector<2x256xf32>
    %61 = vector.extract_strided_slice %60 {offsets = [0, 0], sizes = [2, 64], strides = [1, 1]} : vector<2x256xf32> to vector<2x64xf32>
    %62 = vector.extract_strided_slice %60 {offsets = [0, 64], sizes = [2, 64], strides = [1, 1]} : vector<2x256xf32> to vector<2x64xf32>
    %63 = vector.extract_strided_slice %60 {offsets = [0, 128], sizes = [2, 64], strides = [1, 1]} : vector<2x256xf32> to vector<2x64xf32>
    %64 = vector.extract_strided_slice %60 {offsets = [0, 192], sizes = [2, 64], strides = [1, 1]} : vector<2x256xf32> to vector<2x64xf32>
    %65 = arith.mulf %62, %40 : vector<2x64xf32>
    %66 = arith.mulf %61, %63 : vector<2x64xf32>
    %67 = arith.addf %65, %66 : vector<2x64xf32>
    %68 = math.tanh %67 : vector<2x64xf32>
    %69 = arith.mulf %64, %68 : vector<2x64xf32>
    %70 = vector.extract_strided_slice %69 {offsets = [0, 0], sizes = [2, 32], strides = [1, 1]} : vector<2x64xf32> to vector<2x32xf32>
    %71 = arith.index_cast %c0_i32_17 : i32 to index
    %c0_24 = arith.constant 0 : index
    %c0_25 = arith.constant 0 : index
    %72 = vector.load %arg9[%71, %c0_24, %c0_25] : memref<8x2x32xf32, #tpu.memory_space<vmem>>, vector<1x2x32xf32>
    %73 = vector.shape_cast %72 : vector<1x2x32xf32> to vector<2x32xf32>
    %74 = vector.shape_cast %70 : vector<2x32xf32> to vector<1x2x32xf32>
    tpu.vector_store %arg9[%71, %c0_24, %c0_25], %74 {strides = array<i32>} : memref<8x2x32xf32, #tpu.memory_space<vmem>>, vector<1x2x32xf32>,
    %75 = vector.extract_strided_slice %69 {offsets = [0, 32], sizes = [2, 32], strides = [1, 1]} : vector<2x64xf32> to vector<2x32xf32>
    %c7_i32_26 = arith.constant 7 : i32
    %76 = arith.subi %c7_i32_26, %c0_i32_17 : i32
    %77 = arith.index_cast %76 : i32 to index
    %c0_27 = arith.constant 0 : index
    %c0_28 = arith.constant 0 : index
    %78 = vector.load %arg10[%77, %c0_27, %c0_28] : memref<8x2x32xf32, #tpu.memory_space<vmem>>, vector<1x2x32xf32>
    %79 = vector.shape_cast %78 : vector<1x2x32xf32> to vector<2x32xf32>
    %80 = vector.shape_cast %75 : vector<2x32xf32> to vector<1x2x32xf32>
    tpu.vector_store %arg10[%77, %c0_27, %c0_28], %80 {strides = array<i32>} : memref<8x2x32xf32, #tpu.memory_space<vmem>>, vector<1x2x32xf32>,
    %c1_i32_29 = arith.constant 1 : i32
    %c0_30 = arith.constant 0 : index
    %c0_31 = arith.constant 0 : index
    %81 = vector.load %arg3[%c0_30, %c0_31] : memref<64x256xf32, #tpu.memory_space<vmem>>, vector<64x256xf32>
    %cst_32 = arith.constant dense<0.000000e+00> : vector<2x256xf32>
    %82 = tpu.matmul %69, %81, %cst_32 {dimension_numbers = #tpu.dot_dimension_numbers<[1], [0], [0], [1], [0, 0, 1, 1], [], []>} : vector<2x64xf32>, vector<64x256xf32>, vector<2x256xf32> -> vector<2x256xf32>
    %c2_i32_33 = arith.constant 2 : i32
    %83 = arith.muli %c1_i32_29, %c2_i32_33 : i32
    %84 = arith.index_cast %83 : i32 to index
    %c0_34 = arith.constant 0 : index
    %85 = vector.load %arg8[%84, %c0_34] : memref<16x256xf32, #tpu.memory_space<vmem>>, vector<2x256xf32>
    %c7_i32_35 = arith.constant 7 : i32
    %86 = arith.subi %c7_i32_35, %c1_i32_29 : i32
    %c2_i32_36 = arith.constant 2 : i32
    %87 = arith.muli %86, %c2_i32_36 : i32
    %88 = arith.index_cast %87 : i32 to index
    %c0_37 = arith.constant 0 : index
    %89 = vector.load %arg8[%88, %c0_37] : memref<16x256xf32, #tpu.memory_space<vmem>>, vector<2x256xf32>
    %90 = vector.shape_cast %25 : vector<1x256xi1> to vector<1x256xi1>
    %91 = vector.broadcast %90 : vector<1x256xi1> to vector<2x256xi1>
    %92 = arith.select %91, %85, %89 : vector<2x256xi1>, vector<2x256xf32>
    %93 = arith.addf %82, %92 : vector<2x256xf32>
    %94 = vector.broadcast %33 : vector<1x256xf32> to vector<2x256xf32>
    %95 = arith.mulf %93, %94 : vector<2x256xf32>
    %96 = math.tanh %95 : vector<2x256xf32>
    %97 = vector.broadcast %36 : vector<1x256xf32> to vector<2x256xf32>
    %98 = arith.mulf %96, %97 : vector<2x256xf32>
    %99 = vector.broadcast %39 : vector<1x256xf32> to vector<2x256xf32>
    %100 = arith.addf %98, %99 : vector<2x256xf32>
    %101 = vector.extract_strided_slice %100 {offsets = [0, 0], sizes = [2, 64], strides = [1, 1]} : vector<2x256xf32> to vector<2x64xf32>
    %102 = vector.extract_strided_slice %100 {offsets = [0, 64], sizes = [2, 64], strides = [1, 1]} : vector<2x256xf32> to vector<2x64xf32>
    %103 = vector.extract_strided_slice %100 {offsets = [0, 128], sizes = [2, 64], strides = [1, 1]} : vector<2x256xf32> to vector<2x64xf32>
    %104 = vector.extract_strided_slice %100 {offsets = [0, 192], sizes = [2, 64], strides = [1, 1]} : vector<2x256xf32> to vector<2x64xf32>
    %105 = arith.mulf %102, %67 : vector<2x64xf32>
    %106 = arith.mulf %101, %103 : vector<2x64xf32>
    %107 = arith.addf %105, %106 : vector<2x64xf32>
    %108 = math.tanh %107 : vector<2x64xf32>
    %109 = arith.mulf %104, %108 : vector<2x64xf32>
    %110 = vector.extract_strided_slice %109 {offsets = [0, 0], sizes = [2, 32], strides = [1, 1]} : vector<2x64xf32> to vector<2x32xf32>
    %111 = arith.index_cast %c1_i32_29 : i32 to index
    %c0_38 = arith.constant 0 : index
    %c0_39 = arith.constant 0 : index
    %112 = vector.load %arg9[%111, %c0_38, %c0_39] : memref<8x2x32xf32, #tpu.memory_space<vmem>>, vector<1x2x32xf32>
    %113 = vector.shape_cast %112 : vector<1x2x32xf32> to vector<2x32xf32>
    %114 = vector.shape_cast %110 : vector<2x32xf32> to vector<1x2x32xf32>
    tpu.vector_store %arg9[%111, %c0_38, %c0_39], %114 {strides = array<i32>} : memref<8x2x32xf32, #tpu.memory_space<vmem>>, vector<1x2x32xf32>,
    %115 = vector.extract_strided_slice %109 {offsets = [0, 32], sizes = [2, 32], strides = [1, 1]} : vector<2x64xf32> to vector<2x32xf32>
    %c7_i32_40 = arith.constant 7 : i32
    %116 = arith.subi %c7_i32_40, %c1_i32_29 : i32
    %117 = arith.index_cast %116 : i32 to index
    %c0_41 = arith.constant 0 : index
    %c0_42 = arith.constant 0 : index
    %118 = vector.load %arg10[%117, %c0_41, %c0_42] : memref<8x2x32xf32, #tpu.memory_space<vmem>>, vector<1x2x32xf32>
    %119 = vector.shape_cast %118 : vector<1x2x32xf32> to vector<2x32xf32>
    %120 = vector.shape_cast %115 : vector<2x32xf32> to vector<1x2x32xf32>
    tpu.vector_store %arg10[%117, %c0_41, %c0_42], %120 {strides = array<i32>} : memref<8x2x32xf32, #tpu.memory_space<vmem>>, vector<1x2x32xf32>,
    %c2_i32_43 = arith.constant 2 : i32
    %c0_44 = arith.constant 0 : index
    %c0_45 = arith.constant 0 : index
    %121 = vector.load %arg3[%c0_44, %c0_45] : memref<64x256xf32, #tpu.memory_space<vmem>>, vector<64x256xf32>
    %cst_46 = arith.constant dense<0.000000e+00> : vector<2x256xf32>
    %122 = tpu.matmul %109, %121, %cst_46 {dimension_numbers = #tpu.dot_dimension_numbers<[1], [0], [0], [1], [0, 0, 1, 1], [], []>} : vector<2x64xf32>, vector<64x256xf32>, vector<2x256xf32> -> vector<2x256xf32>
    %c2_i32_47 = arith.constant 2 : i32
    %123 = arith.muli %c2_i32_43, %c2_i32_47 : i32
    %124 = arith.index_cast %123 : i32 to index
    %c0_48 = arith.constant 0 : index
    %125 = vector.load %arg8[%124, %c0_48] : memref<16x256xf32, #tpu.memory_space<vmem>>, vector<2x256xf32>
    %c7_i32_49 = arith.constant 7 : i32
    %126 = arith.subi %c7_i32_49, %c2_i32_43 : i32
    %c2_i32_50 = arith.constant 2 : i32
    %127 = arith.muli %126, %c2_i32_50 : i32
    %128 = arith.index_cast %127 : i32 to index
    %c0_51 = arith.constant 0 : index
    %129 = vector.load %arg8[%128, %c0_51] : memref<16x256xf32, #tpu.memory_space<vmem>>, vector<2x256xf32>
    %130 = vector.shape_cast %25 : vector<1x256xi1> to vector<1x256xi1>
    %131 = vector.broadcast %130 : vector<1x256xi1> to vector<2x256xi1>
    %132 = arith.select %131, %125, %129 : vector<2x256xi1>, vector<2x256xf32>
    %133 = arith.addf %122, %132 : vector<2x256xf32>
    %134 = vector.broadcast %33 : vector<1x256xf32> to vector<2x256xf32>
    %135 = arith.mulf %133, %134 : vector<2x256xf32>
    %136 = math.tanh %135 : vector<2x256xf32>
    %137 = vector.broadcast %36 : vector<1x256xf32> to vector<2x256xf32>
    %138 = arith.mulf %136, %137 : vector<2x256xf32>
    %139 = vector.broadcast %39 : vector<1x256xf32> to vector<2x256xf32>
    %140 = arith.addf %138, %139 : vector<2x256xf32>
    %141 = vector.extract_strided_slice %140 {offsets = [0, 0], sizes = [2, 64], strides = [1, 1]} : vector<2x256xf32> to vector<2x64xf32>
    %142 = vector.extract_strided_slice %140 {offsets = [0, 64], sizes = [2, 64], strides = [1, 1]} : vector<2x256xf32> to vector<2x64xf32>
    %143 = vector.extract_strided_slice %140 {offsets = [0, 128], sizes = [2, 64], strides = [1, 1]} : vector<2x256xf32> to vector<2x64xf32>
    %144 = vector.extract_strided_slice %140 {offsets = [0, 192], sizes = [2, 64], strides = [1, 1]} : vector<2x256xf32> to vector<2x64xf32>
    %145 = arith.mulf %142, %107 : vector<2x64xf32>
    %146 = arith.mulf %141, %143 : vector<2x64xf32>
    %147 = arith.addf %145, %146 : vector<2x64xf32>
    %148 = math.tanh %147 : vector<2x64xf32>
    %149 = arith.mulf %144, %148 : vector<2x64xf32>
    %150 = vector.extract_strided_slice %149 {offsets = [0, 0], sizes = [2, 32], strides = [1, 1]} : vector<2x64xf32> to vector<2x32xf32>
    %151 = arith.index_cast %c2_i32_43 : i32 to index
    %c0_52 = arith.constant 0 : index
    %c0_53 = arith.constant 0 : index
    %152 = vector.load %arg9[%151, %c0_52, %c0_53] : memref<8x2x32xf32, #tpu.memory_space<vmem>>, vector<1x2x32xf32>
    %153 = vector.shape_cast %152 : vector<1x2x32xf32> to vector<2x32xf32>
    %154 = vector.shape_cast %150 : vector<2x32xf32> to vector<1x2x32xf32>
    tpu.vector_store %arg9[%151, %c0_52, %c0_53], %154 {strides = array<i32>} : memref<8x2x32xf32, #tpu.memory_space<vmem>>, vector<1x2x32xf32>,
    %155 = vector.extract_strided_slice %149 {offsets = [0, 32], sizes = [2, 32], strides = [1, 1]} : vector<2x64xf32> to vector<2x32xf32>
    %c7_i32_54 = arith.constant 7 : i32
    %156 = arith.subi %c7_i32_54, %c2_i32_43 : i32
    %157 = arith.index_cast %156 : i32 to index
    %c0_55 = arith.constant 0 : index
    %c0_56 = arith.constant 0 : index
    %158 = vector.load %arg10[%157, %c0_55, %c0_56] : memref<8x2x32xf32, #tpu.memory_space<vmem>>, vector<1x2x32xf32>
    %159 = vector.shape_cast %158 : vector<1x2x32xf32> to vector<2x32xf32>
    %160 = vector.shape_cast %155 : vector<2x32xf32> to vector<1x2x32xf32>
    tpu.vector_store %arg10[%157, %c0_55, %c0_56], %160 {strides = array<i32>} : memref<8x2x32xf32, #tpu.memory_space<vmem>>, vector<1x2x32xf32>,
    %c3_i32 = arith.constant 3 : i32
    %c0_57 = arith.constant 0 : index
    %c0_58 = arith.constant 0 : index
    %161 = vector.load %arg3[%c0_57, %c0_58] : memref<64x256xf32, #tpu.memory_space<vmem>>, vector<64x256xf32>
    %cst_59 = arith.constant dense<0.000000e+00> : vector<2x256xf32>
    %162 = tpu.matmul %149, %161, %cst_59 {dimension_numbers = #tpu.dot_dimension_numbers<[1], [0], [0], [1], [0, 0, 1, 1], [], []>} : vector<2x64xf32>, vector<64x256xf32>, vector<2x256xf32> -> vector<2x256xf32>
    %c2_i32_60 = arith.constant 2 : i32
    %163 = arith.muli %c3_i32, %c2_i32_60 : i32
    %164 = arith.index_cast %163 : i32 to index
    %c0_61 = arith.constant 0 : index
    %165 = vector.load %arg8[%164, %c0_61] : memref<16x256xf32, #tpu.memory_space<vmem>>, vector<2x256xf32>
    %c7_i32_62 = arith.constant 7 : i32
    %166 = arith.subi %c7_i32_62, %c3_i32 : i32
    %c2_i32_63 = arith.constant 2 : i32
    %167 = arith.muli %166, %c2_i32_63 : i32
    %168 = arith.index_cast %167 : i32 to index
    %c0_64 = arith.constant 0 : index
    %169 = vector.load %arg8[%168, %c0_64] : memref<16x256xf32, #tpu.memory_space<vmem>>, vector<2x256xf32>
    %170 = vector.shape_cast %25 : vector<1x256xi1> to vector<1x256xi1>
    %171 = vector.broadcast %170 : vector<1x256xi1> to vector<2x256xi1>
    %172 = arith.select %171, %165, %169 : vector<2x256xi1>, vector<2x256xf32>
    %173 = arith.addf %162, %172 : vector<2x256xf32>
    %174 = vector.broadcast %33 : vector<1x256xf32> to vector<2x256xf32>
    %175 = arith.mulf %173, %174 : vector<2x256xf32>
    %176 = math.tanh %175 : vector<2x256xf32>
    %177 = vector.broadcast %36 : vector<1x256xf32> to vector<2x256xf32>
    %178 = arith.mulf %176, %177 : vector<2x256xf32>
    %179 = vector.broadcast %39 : vector<1x256xf32> to vector<2x256xf32>
    %180 = arith.addf %178, %179 : vector<2x256xf32>
    %181 = vector.extract_strided_slice %180 {offsets = [0, 0], sizes = [2, 64], strides = [1, 1]} : vector<2x256xf32> to vector<2x64xf32>
    %182 = vector.extract_strided_slice %180 {offsets = [0, 64], sizes = [2, 64], strides = [1, 1]} : vector<2x256xf32> to vector<2x64xf32>
    %183 = vector.extract_strided_slice %180 {offsets = [0, 128], sizes = [2, 64], strides = [1, 1]} : vector<2x256xf32> to vector<2x64xf32>
    %184 = vector.extract_strided_slice %180 {offsets = [0, 192], sizes = [2, 64], strides = [1, 1]} : vector<2x256xf32> to vector<2x64xf32>
    %185 = arith.mulf %182, %147 : vector<2x64xf32>
    %186 = arith.mulf %181, %183 : vector<2x64xf32>
    %187 = arith.addf %185, %186 : vector<2x64xf32>
    %188 = math.tanh %187 : vector<2x64xf32>
    %189 = arith.mulf %184, %188 : vector<2x64xf32>
    %190 = vector.extract_strided_slice %189 {offsets = [0, 0], sizes = [2, 32], strides = [1, 1]} : vector<2x64xf32> to vector<2x32xf32>
    %191 = arith.index_cast %c3_i32 : i32 to index
    %c0_65 = arith.constant 0 : index
    %c0_66 = arith.constant 0 : index
    %192 = vector.load %arg9[%191, %c0_65, %c0_66] : memref<8x2x32xf32, #tpu.memory_space<vmem>>, vector<1x2x32xf32>
    %193 = vector.shape_cast %192 : vector<1x2x32xf32> to vector<2x32xf32>
    %194 = vector.shape_cast %190 : vector<2x32xf32> to vector<1x2x32xf32>
    tpu.vector_store %arg9[%191, %c0_65, %c0_66], %194 {strides = array<i32>} : memref<8x2x32xf32, #tpu.memory_space<vmem>>, vector<1x2x32xf32>,
    %195 = vector.extract_strided_slice %189 {offsets = [0, 32], sizes = [2, 32], strides = [1, 1]} : vector<2x64xf32> to vector<2x32xf32>
    %c7_i32_67 = arith.constant 7 : i32
    %196 = arith.subi %c7_i32_67, %c3_i32 : i32
    %197 = arith.index_cast %196 : i32 to index
    %c0_68 = arith.constant 0 : index
    %c0_69 = arith.constant 0 : index
    %198 = vector.load %arg10[%197, %c0_68, %c0_69] : memref<8x2x32xf32, #tpu.memory_space<vmem>>, vector<1x2x32xf32>
    %199 = vector.shape_cast %198 : vector<1x2x32xf32> to vector<2x32xf32>
    %200 = vector.shape_cast %195 : vector<2x32xf32> to vector<1x2x32xf32>
    tpu.vector_store %arg10[%197, %c0_68, %c0_69], %200 {strides = array<i32>} : memref<8x2x32xf32, #tpu.memory_space<vmem>>, vector<1x2x32xf32>,
    %c4_i32 = arith.constant 4 : i32
    %c0_70 = arith.constant 0 : index
    %c0_71 = arith.constant 0 : index
    %201 = vector.load %arg3[%c0_70, %c0_71] : memref<64x256xf32, #tpu.memory_space<vmem>>, vector<64x256xf32>
    %cst_72 = arith.constant dense<0.000000e+00> : vector<2x256xf32>
    %202 = tpu.matmul %189, %201, %cst_72 {dimension_numbers = #tpu.dot_dimension_numbers<[1], [0], [0], [1], [0, 0, 1, 1], [], []>} : vector<2x64xf32>, vector<64x256xf32>, vector<2x256xf32> -> vector<2x256xf32>
    %c2_i32_73 = arith.constant 2 : i32
    %203 = arith.muli %c4_i32, %c2_i32_73 : i32
    %204 = arith.index_cast %203 : i32 to index
    %c0_74 = arith.constant 0 : index
    %205 = vector.load %arg8[%204, %c0_74] : memref<16x256xf32, #tpu.memory_space<vmem>>, vector<2x256xf32>
    %c7_i32_75 = arith.constant 7 : i32
    %206 = arith.subi %c7_i32_75, %c4_i32 : i32
    %c2_i32_76 = arith.constant 2 : i32
    %207 = arith.muli %206, %c2_i32_76 : i32
    %208 = arith.index_cast %207 : i32 to index
    %c0_77 = arith.constant 0 : index
    %209 = vector.load %arg8[%208, %c0_77] : memref<16x256xf32, #tpu.memory_space<vmem>>, vector<2x256xf32>
    %210 = vector.shape_cast %25 : vector<1x256xi1> to vector<1x256xi1>
    %211 = vector.broadcast %210 : vector<1x256xi1> to vector<2x256xi1>
    %212 = arith.select %211, %205, %209 : vector<2x256xi1>, vector<2x256xf32>
    %213 = arith.addf %202, %212 : vector<2x256xf32>
    %214 = vector.broadcast %33 : vector<1x256xf32> to vector<2x256xf32>
    %215 = arith.mulf %213, %214 : vector<2x256xf32>
    %216 = math.tanh %215 : vector<2x256xf32>
    %217 = vector.broadcast %36 : vector<1x256xf32> to vector<2x256xf32>
    %218 = arith.mulf %216, %217 : vector<2x256xf32>
    %219 = vector.broadcast %39 : vector<1x256xf32> to vector<2x256xf32>
    %220 = arith.addf %218, %219 : vector<2x256xf32>
    %221 = vector.extract_strided_slice %220 {offsets = [0, 0], sizes = [2, 64], strides = [1, 1]} : vector<2x256xf32> to vector<2x64xf32>
    %222 = vector.extract_strided_slice %220 {offsets = [0, 64], sizes = [2, 64], strides = [1, 1]} : vector<2x256xf32> to vector<2x64xf32>
    %223 = vector.extract_strided_slice %220 {offsets = [0, 128], sizes = [2, 64], strides = [1, 1]} : vector<2x256xf32> to vector<2x64xf32>
    %224 = vector.extract_strided_slice %220 {offsets = [0, 192], sizes = [2, 64], strides = [1, 1]} : vector<2x256xf32> to vector<2x64xf32>
    %225 = arith.mulf %222, %187 : vector<2x64xf32>
    %226 = arith.mulf %221, %223 : vector<2x64xf32>
    %227 = arith.addf %225, %226 : vector<2x64xf32>
    %228 = math.tanh %227 : vector<2x64xf32>
    %229 = arith.mulf %224, %228 : vector<2x64xf32>
    %230 = vector.extract_strided_slice %229 {offsets = [0, 0], sizes = [2, 32], strides = [1, 1]} : vector<2x64xf32> to vector<2x32xf32>
    %231 = arith.index_cast %c4_i32 : i32 to index
    %c0_78 = arith.constant 0 : index
    %c0_79 = arith.constant 0 : index
    %232 = vector.load %arg9[%231, %c0_78, %c0_79] : memref<8x2x32xf32, #tpu.memory_space<vmem>>, vector<1x2x32xf32>
    %233 = vector.shape_cast %232 : vector<1x2x32xf32> to vector<2x32xf32>
    %234 = vector.shape_cast %230 : vector<2x32xf32> to vector<1x2x32xf32>
    tpu.vector_store %arg9[%231, %c0_78, %c0_79], %234 {strides = array<i32>} : memref<8x2x32xf32, #tpu.memory_space<vmem>>, vector<1x2x32xf32>,
    %235 = vector.extract_strided_slice %229 {offsets = [0, 32], sizes = [2, 32], strides = [1, 1]} : vector<2x64xf32> to vector<2x32xf32>
    %c7_i32_80 = arith.constant 7 : i32
    %236 = arith.subi %c7_i32_80, %c4_i32 : i32
    %237 = arith.index_cast %236 : i32 to index
    %c0_81 = arith.constant 0 : index
    %c0_82 = arith.constant 0 : index
    %238 = vector.load %arg10[%237, %c0_81, %c0_82] : memref<8x2x32xf32, #tpu.memory_space<vmem>>, vector<1x2x32xf32>
    %239 = vector.shape_cast %238 : vector<1x2x32xf32> to vector<2x32xf32>
    %240 = vector.shape_cast %235 : vector<2x32xf32> to vector<1x2x32xf32>
    tpu.vector_store %arg10[%237, %c0_81, %c0_82], %240 {strides = array<i32>} : memref<8x2x32xf32, #tpu.memory_space<vmem>>, vector<1x2x32xf32>,
    %c5_i32 = arith.constant 5 : i32
    %c0_83 = arith.constant 0 : index
    %c0_84 = arith.constant 0 : index
    %241 = vector.load %arg3[%c0_83, %c0_84] : memref<64x256xf32, #tpu.memory_space<vmem>>, vector<64x256xf32>
    %cst_85 = arith.constant dense<0.000000e+00> : vector<2x256xf32>
    %242 = tpu.matmul %229, %241, %cst_85 {dimension_numbers = #tpu.dot_dimension_numbers<[1], [0], [0], [1], [0, 0, 1, 1], [], []>} : vector<2x64xf32>, vector<64x256xf32>, vector<2x256xf32> -> vector<2x256xf32>
    %c2_i32_86 = arith.constant 2 : i32
    %243 = arith.muli %c5_i32, %c2_i32_86 : i32
    %244 = arith.index_cast %243 : i32 to index
    %c0_87 = arith.constant 0 : index
    %245 = vector.load %arg8[%244, %c0_87] : memref<16x256xf32, #tpu.memory_space<vmem>>, vector<2x256xf32>
    %c7_i32_88 = arith.constant 7 : i32
    %246 = arith.subi %c7_i32_88, %c5_i32 : i32
    %c2_i32_89 = arith.constant 2 : i32
    %247 = arith.muli %246, %c2_i32_89 : i32
    %248 = arith.index_cast %247 : i32 to index
    %c0_90 = arith.constant 0 : index
    %249 = vector.load %arg8[%248, %c0_90] : memref<16x256xf32, #tpu.memory_space<vmem>>, vector<2x256xf32>
    %250 = vector.shape_cast %25 : vector<1x256xi1> to vector<1x256xi1>
    %251 = vector.broadcast %250 : vector<1x256xi1> to vector<2x256xi1>
    %252 = arith.select %251, %245, %249 : vector<2x256xi1>, vector<2x256xf32>
    %253 = arith.addf %242, %252 : vector<2x256xf32>
    %254 = vector.broadcast %33 : vector<1x256xf32> to vector<2x256xf32>
    %255 = arith.mulf %253, %254 : vector<2x256xf32>
    %256 = math.tanh %255 : vector<2x256xf32>
    %257 = vector.broadcast %36 : vector<1x256xf32> to vector<2x256xf32>
    %258 = arith.mulf %256, %257 : vector<2x256xf32>
    %259 = vector.broadcast %39 : vector<1x256xf32> to vector<2x256xf32>
    %260 = arith.addf %258, %259 : vector<2x256xf32>
    %261 = vector.extract_strided_slice %260 {offsets = [0, 0], sizes = [2, 64], strides = [1, 1]} : vector<2x256xf32> to vector<2x64xf32>
    %262 = vector.extract_strided_slice %260 {offsets = [0, 64], sizes = [2, 64], strides = [1, 1]} : vector<2x256xf32> to vector<2x64xf32>
    %263 = vector.extract_strided_slice %260 {offsets = [0, 128], sizes = [2, 64], strides = [1, 1]} : vector<2x256xf32> to vector<2x64xf32>
    %264 = vector.extract_strided_slice %260 {offsets = [0, 192], sizes = [2, 64], strides = [1, 1]} : vector<2x256xf32> to vector<2x64xf32>
    %265 = arith.mulf %262, %227 : vector<2x64xf32>
    %266 = arith.mulf %261, %263 : vector<2x64xf32>
    %267 = arith.addf %265, %266 : vector<2x64xf32>
    %268 = math.tanh %267 : vector<2x64xf32>
    %269 = arith.mulf %264, %268 : vector<2x64xf32>
    %270 = vector.extract_strided_slice %269 {offsets = [0, 0], sizes = [2, 32], strides = [1, 1]} : vector<2x64xf32> to vector<2x32xf32>
    %271 = arith.index_cast %c5_i32 : i32 to index
    %c0_91 = arith.constant 0 : index
    %c0_92 = arith.constant 0 : index
    %272 = vector.load %arg9[%271, %c0_91, %c0_92] : memref<8x2x32xf32, #tpu.memory_space<vmem>>, vector<1x2x32xf32>
    %273 = vector.shape_cast %272 : vector<1x2x32xf32> to vector<2x32xf32>
    %274 = vector.shape_cast %270 : vector<2x32xf32> to vector<1x2x32xf32>
    tpu.vector_store %arg9[%271, %c0_91, %c0_92], %274 {strides = array<i32>} : memref<8x2x32xf32, #tpu.memory_space<vmem>>, vector<1x2x32xf32>,
    %275 = vector.extract_strided_slice %269 {offsets = [0, 32], sizes = [2, 32], strides = [1, 1]} : vector<2x64xf32> to vector<2x32xf32>
    %c7_i32_93 = arith.constant 7 : i32
    %276 = arith.subi %c7_i32_93, %c5_i32 : i32
    %277 = arith.index_cast %276 : i32 to index
    %c0_94 = arith.constant 0 : index
    %c0_95 = arith.constant 0 : index
    %278 = vector.load %arg10[%277, %c0_94, %c0_95] : memref<8x2x32xf32, #tpu.memory_space<vmem>>, vector<1x2x32xf32>
    %279 = vector.shape_cast %278 : vector<1x2x32xf32> to vector<2x32xf32>
    %280 = vector.shape_cast %275 : vector<2x32xf32> to vector<1x2x32xf32>
    tpu.vector_store %arg10[%277, %c0_94, %c0_95], %280 {strides = array<i32>} : memref<8x2x32xf32, #tpu.memory_space<vmem>>, vector<1x2x32xf32>,
    %c6_i32 = arith.constant 6 : i32
    %c0_96 = arith.constant 0 : index
    %c0_97 = arith.constant 0 : index
    %281 = vector.load %arg3[%c0_96, %c0_97] : memref<64x256xf32, #tpu.memory_space<vmem>>, vector<64x256xf32>
    %cst_98 = arith.constant dense<0.000000e+00> : vector<2x256xf32>
    %282 = tpu.matmul %269, %281, %cst_98 {dimension_numbers = #tpu.dot_dimension_numbers<[1], [0], [0], [1], [0, 0, 1, 1], [], []>} : vector<2x64xf32>, vector<64x256xf32>, vector<2x256xf32> -> vector<2x256xf32>
    %c2_i32_99 = arith.constant 2 : i32
    %283 = arith.muli %c6_i32, %c2_i32_99 : i32
    %284 = arith.index_cast %283 : i32 to index
    %c0_100 = arith.constant 0 : index
    %285 = vector.load %arg8[%284, %c0_100] : memref<16x256xf32, #tpu.memory_space<vmem>>, vector<2x256xf32>
    %c7_i32_101 = arith.constant 7 : i32
    %286 = arith.subi %c7_i32_101, %c6_i32 : i32
    %c2_i32_102 = arith.constant 2 : i32
    %287 = arith.muli %286, %c2_i32_102 : i32
    %288 = arith.index_cast %287 : i32 to index
    %c0_103 = arith.constant 0 : index
    %289 = vector.load %arg8[%288, %c0_103] : memref<16x256xf32, #tpu.memory_space<vmem>>, vector<2x256xf32>
    %290 = vector.shape_cast %25 : vector<1x256xi1> to vector<1x256xi1>
    %291 = vector.broadcast %290 : vector<1x256xi1> to vector<2x256xi1>
    %292 = arith.select %291, %285, %289 : vector<2x256xi1>, vector<2x256xf32>
    %293 = arith.addf %282, %292 : vector<2x256xf32>
    %294 = vector.broadcast %33 : vector<1x256xf32> to vector<2x256xf32>
    %295 = arith.mulf %293, %294 : vector<2x256xf32>
    %296 = math.tanh %295 : vector<2x256xf32>
    %297 = vector.broadcast %36 : vector<1x256xf32> to vector<2x256xf32>
    %298 = arith.mulf %296, %297 : vector<2x256xf32>
    %299 = vector.broadcast %39 : vector<1x256xf32> to vector<2x256xf32>
    %300 = arith.addf %298, %299 : vector<2x256xf32>
    %301 = vector.extract_strided_slice %300 {offsets = [0, 0], sizes = [2, 64], strides = [1, 1]} : vector<2x256xf32> to vector<2x64xf32>
    %302 = vector.extract_strided_slice %300 {offsets = [0, 64], sizes = [2, 64], strides = [1, 1]} : vector<2x256xf32> to vector<2x64xf32>
    %303 = vector.extract_strided_slice %300 {offsets = [0, 128], sizes = [2, 64], strides = [1, 1]} : vector<2x256xf32> to vector<2x64xf32>
    %304 = vector.extract_strided_slice %300 {offsets = [0, 192], sizes = [2, 64], strides = [1, 1]} : vector<2x256xf32> to vector<2x64xf32>
    %305 = arith.mulf %302, %267 : vector<2x64xf32>
    %306 = arith.mulf %301, %303 : vector<2x64xf32>
    %307 = arith.addf %305, %306 : vector<2x64xf32>
    %308 = math.tanh %307 : vector<2x64xf32>
    %309 = arith.mulf %304, %308 : vector<2x64xf32>
    %310 = vector.extract_strided_slice %309 {offsets = [0, 0], sizes = [2, 32], strides = [1, 1]} : vector<2x64xf32> to vector<2x32xf32>
    %311 = arith.index_cast %c6_i32 : i32 to index
    %c0_104 = arith.constant 0 : index
    %c0_105 = arith.constant 0 : index
    %312 = vector.load %arg9[%311, %c0_104, %c0_105] : memref<8x2x32xf32, #tpu.memory_space<vmem>>, vector<1x2x32xf32>
    %313 = vector.shape_cast %312 : vector<1x2x32xf32> to vector<2x32xf32>
    %314 = vector.shape_cast %310 : vector<2x32xf32> to vector<1x2x32xf32>
    tpu.vector_store %arg9[%311, %c0_104, %c0_105], %314 {strides = array<i32>} : memref<8x2x32xf32, #tpu.memory_space<vmem>>, vector<1x2x32xf32>,
    %315 = vector.extract_strided_slice %309 {offsets = [0, 32], sizes = [2, 32], strides = [1, 1]} : vector<2x64xf32> to vector<2x32xf32>
    %c7_i32_106 = arith.constant 7 : i32
    %316 = arith.subi %c7_i32_106, %c6_i32 : i32
    %317 = arith.index_cast %316 : i32 to index
    %c0_107 = arith.constant 0 : index
    %c0_108 = arith.constant 0 : index
    %318 = vector.load %arg10[%317, %c0_107, %c0_108] : memref<8x2x32xf32, #tpu.memory_space<vmem>>, vector<1x2x32xf32>
    %319 = vector.shape_cast %318 : vector<1x2x32xf32> to vector<2x32xf32>
    %320 = vector.shape_cast %315 : vector<2x32xf32> to vector<1x2x32xf32>
    tpu.vector_store %arg10[%317, %c0_107, %c0_108], %320 {strides = array<i32>} : memref<8x2x32xf32, #tpu.memory_space<vmem>>, vector<1x2x32xf32>,
    %c7_i32_109 = arith.constant 7 : i32
    %c0_110 = arith.constant 0 : index
    %c0_111 = arith.constant 0 : index
    %321 = vector.load %arg3[%c0_110, %c0_111] : memref<64x256xf32, #tpu.memory_space<vmem>>, vector<64x256xf32>
    %cst_112 = arith.constant dense<0.000000e+00> : vector<2x256xf32>
    %322 = tpu.matmul %309, %321, %cst_112 {dimension_numbers = #tpu.dot_dimension_numbers<[1], [0], [0], [1], [0, 0, 1, 1], [], []>} : vector<2x64xf32>, vector<64x256xf32>, vector<2x256xf32> -> vector<2x256xf32>
    %c2_i32_113 = arith.constant 2 : i32
    %323 = arith.muli %c7_i32_109, %c2_i32_113 : i32
    %324 = arith.index_cast %323 : i32 to index
    %c0_114 = arith.constant 0 : index
    %325 = vector.load %arg8[%324, %c0_114] : memref<16x256xf32, #tpu.memory_space<vmem>>, vector<2x256xf32>
    %c7_i32_115 = arith.constant 7 : i32
    %326 = arith.subi %c7_i32_115, %c7_i32_109 : i32
    %c2_i32_116 = arith.constant 2 : i32
    %327 = arith.muli %326, %c2_i32_116 : i32
    %328 = arith.index_cast %327 : i32 to index
    %c0_117 = arith.constant 0 : index
    %329 = vector.load %arg8[%328, %c0_117] : memref<16x256xf32, #tpu.memory_space<vmem>>, vector<2x256xf32>
    %330 = vector.shape_cast %25 : vector<1x256xi1> to vector<1x256xi1>
    %331 = vector.broadcast %330 : vector<1x256xi1> to vector<2x256xi1>
    %332 = arith.select %331, %325, %329 : vector<2x256xi1>, vector<2x256xf32>
    %333 = arith.addf %322, %332 : vector<2x256xf32>
    %334 = vector.broadcast %33 : vector<1x256xf32> to vector<2x256xf32>
    %335 = arith.mulf %333, %334 : vector<2x256xf32>
    %336 = math.tanh %335 : vector<2x256xf32>
    %337 = vector.broadcast %36 : vector<1x256xf32> to vector<2x256xf32>
    %338 = arith.mulf %336, %337 : vector<2x256xf32>
    %339 = vector.broadcast %39 : vector<1x256xf32> to vector<2x256xf32>
    %340 = arith.addf %338, %339 : vector<2x256xf32>
    %341 = vector.extract_strided_slice %340 {offsets = [0, 0], sizes = [2, 64], strides = [1, 1]} : vector<2x256xf32> to vector<2x64xf32>
    %342 = vector.extract_strided_slice %340 {offsets = [0, 64], sizes = [2, 64], strides = [1, 1]} : vector<2x256xf32> to vector<2x64xf32>
    %343 = vector.extract_strided_slice %340 {offsets = [0, 128], sizes = [2, 64], strides = [1, 1]} : vector<2x256xf32> to vector<2x64xf32>
    %344 = vector.extract_strided_slice %340 {offsets = [0, 192], sizes = [2, 64], strides = [1, 1]} : vector<2x256xf32> to vector<2x64xf32>
    %345 = arith.mulf %342, %307 : vector<2x64xf32>
    %346 = arith.mulf %341, %343 : vector<2x64xf32>
    %347 = arith.addf %345, %346 : vector<2x64xf32>
    %348 = math.tanh %347 : vector<2x64xf32>
    %349 = arith.mulf %344, %348 : vector<2x64xf32>
    %350 = vector.extract_strided_slice %349 {offsets = [0, 0], sizes = [2, 32], strides = [1, 1]} : vector<2x64xf32> to vector<2x32xf32>
    %351 = arith.index_cast %c7_i32_109 : i32 to index
    %c0_118 = arith.constant 0 : index
    %c0_119 = arith.constant 0 : index
    %352 = vector.load %arg9[%351, %c0_118, %c0_119] : memref<8x2x32xf32, #tpu.memory_space<vmem>>, vector<1x2x32xf32>
    %353 = vector.shape_cast %352 : vector<1x2x32xf32> to vector<2x32xf32>
    %354 = vector.shape_cast %350 : vector<2x32xf32> to vector<1x2x32xf32>
    tpu.vector_store %arg9[%351, %c0_118, %c0_119], %354 {strides = array<i32>} : memref<8x2x32xf32, #tpu.memory_space<vmem>>, vector<1x2x32xf32>,
    %355 = vector.extract_strided_slice %349 {offsets = [0, 32], sizes = [2, 32], strides = [1, 1]} : vector<2x64xf32> to vector<2x32xf32>
    %c7_i32_120 = arith.constant 7 : i32
    %356 = arith.subi %c7_i32_120, %c7_i32_109 : i32
    %357 = arith.index_cast %356 : i32 to index
    %c0_121 = arith.constant 0 : index
    %c0_122 = arith.constant 0 : index
    %358 = vector.load %arg10[%357, %c0_121, %c0_122] : memref<8x2x32xf32, #tpu.memory_space<vmem>>, vector<1x2x32xf32>
    %359 = vector.shape_cast %358 : vector<1x2x32xf32> to vector<2x32xf32>
    %360 = vector.shape_cast %355 : vector<2x32xf32> to vector<1x2x32xf32>
    tpu.vector_store %arg10[%357, %c0_121, %c0_122], %360 {strides = array<i32>} : memref<8x2x32xf32, #tpu.memory_space<vmem>>, vector<1x2x32xf32>,
    %c8_i32 = arith.constant 8 : i32
    %c0_i32_123 = arith.constant 0 : i32
    %361 = arith.index_cast %c0_i32_123 : i32 to index
    %c0_124 = arith.constant 0 : index
    %c0_125 = arith.constant 0 : index
    %362 = vector.load %arg9[%361, %c0_124, %c0_125] : memref<8x2x32xf32, #tpu.memory_space<vmem>>, vector<1x2x32xf32>
    %363 = vector.shape_cast %362 : vector<1x2x32xf32> to vector<2x32xf32>
    %c0_126 = arith.constant 0 : index
    %c0_127 = arith.constant 0 : index
    %364 = vector.load %arg4[%c0_126, %c0_127] : memref<32x16xf32, #tpu.memory_space<vmem>>, vector<32x16xf32>
    %cst_128 = arith.constant dense<0.000000e+00> : vector<2x16xf32>
    %365 = tpu.matmul %363, %364, %cst_128 {dimension_numbers = #tpu.dot_dimension_numbers<[1], [0], [0], [1], [0, 0, 1, 1], [], []>} : vector<2x32xf32>, vector<32x16xf32>, vector<2x16xf32> -> vector<2x16xf32>
    %366 = arith.index_cast %c0_i32_123 : i32 to index
    %c0_129 = arith.constant 0 : index
    %c0_130 = arith.constant 0 : index
    %367 = vector.load %arg10[%366, %c0_129, %c0_130] : memref<8x2x32xf32, #tpu.memory_space<vmem>>, vector<1x2x32xf32>
    %368 = vector.shape_cast %367 : vector<1x2x32xf32> to vector<2x32xf32>
    %c0_131 = arith.constant 0 : index
    %c0_132 = arith.constant 0 : index
    %369 = vector.load %arg5[%c0_131, %c0_132] : memref<32x16xf32, #tpu.memory_space<vmem>>, vector<32x16xf32>
    %cst_133 = arith.constant dense<0.000000e+00> : vector<2x16xf32>
    %370 = tpu.matmul %368, %369, %cst_133 {dimension_numbers = #tpu.dot_dimension_numbers<[1], [0], [0], [1], [0, 0, 1, 1], [], []>} : vector<2x32xf32>, vector<32x16xf32>, vector<2x16xf32> -> vector<2x16xf32>
    %371 = arith.addf %365, %370 : vector<2x16xf32>
    %c0_134 = arith.constant 0 : index
    %c0_135 = arith.constant 0 : index
    %372 = vector.load %arg6[%c0_134, %c0_135] : memref<1x16xf32, #tpu.memory_space<vmem>>, vector<1x16xf32>
    %373 = vector.broadcast %372 : vector<1x16xf32> to vector<2x16xf32>
    %374 = arith.addf %371, %373 : vector<2x16xf32>
    %375 = arith.index_cast %c0_i32_123 : i32 to index
    %c0_136 = arith.constant 0 : index
    %c0_137 = arith.constant 0 : index
    %376 = vector.load %arg7[%375, %c0_136, %c0_137] : memref<8x2x16xf32, #tpu.memory_space<vmem>>, vector<1x2x16xf32>
    %377 = vector.shape_cast %376 : vector<1x2x16xf32> to vector<2x16xf32>
    %378 = vector.shape_cast %374 : vector<2x16xf32> to vector<1x2x16xf32>
    tpu.vector_store %arg7[%375, %c0_136, %c0_137], %378 {strides = array<i32>} : memref<8x2x16xf32, #tpu.memory_space<vmem>>, vector<1x2x16xf32>,
    %c1_i32_138 = arith.constant 1 : i32
    %379 = arith.index_cast %c1_i32_138 : i32 to index
    %c0_139 = arith.constant 0 : index
    %c0_140 = arith.constant 0 : index
    %380 = vector.load %arg9[%379, %c0_139, %c0_140] : memref<8x2x32xf32, #tpu.memory_space<vmem>>, vector<1x2x32xf32>
    %381 = vector.shape_cast %380 : vector<1x2x32xf32> to vector<2x32xf32>
    %c0_141 = arith.constant 0 : index
    %c0_142 = arith.constant 0 : index
    %382 = vector.load %arg4[%c0_141, %c0_142] : memref<32x16xf32, #tpu.memory_space<vmem>>, vector<32x16xf32>
    %cst_143 = arith.constant dense<0.000000e+00> : vector<2x16xf32>
    %383 = tpu.matmul %381, %382, %cst_143 {dimension_numbers = #tpu.dot_dimension_numbers<[1], [0], [0], [1], [0, 0, 1, 1], [], []>} : vector<2x32xf32>, vector<32x16xf32>, vector<2x16xf32> -> vector<2x16xf32>
    %384 = arith.index_cast %c1_i32_138 : i32 to index
    %c0_144 = arith.constant 0 : index
    %c0_145 = arith.constant 0 : index
    %385 = vector.load %arg10[%384, %c0_144, %c0_145] : memref<8x2x32xf32, #tpu.memory_space<vmem>>, vector<1x2x32xf32>
    %386 = vector.shape_cast %385 : vector<1x2x32xf32> to vector<2x32xf32>
    %c0_146 = arith.constant 0 : index
    %c0_147 = arith.constant 0 : index
    %387 = vector.load %arg5[%c0_146, %c0_147] : memref<32x16xf32, #tpu.memory_space<vmem>>, vector<32x16xf32>
    %cst_148 = arith.constant dense<0.000000e+00> : vector<2x16xf32>
    %388 = tpu.matmul %386, %387, %cst_148 {dimension_numbers = #tpu.dot_dimension_numbers<[1], [0], [0], [1], [0, 0, 1, 1], [], []>} : vector<2x32xf32>, vector<32x16xf32>, vector<2x16xf32> -> vector<2x16xf32>
    %389 = arith.addf %383, %388 : vector<2x16xf32>
    %c0_149 = arith.constant 0 : index
    %c0_150 = arith.constant 0 : index
    %390 = vector.load %arg6[%c0_149, %c0_150] : memref<1x16xf32, #tpu.memory_space<vmem>>, vector<1x16xf32>
    %391 = vector.broadcast %390 : vector<1x16xf32> to vector<2x16xf32>
    %392 = arith.addf %389, %391 : vector<2x16xf32>
    %393 = arith.index_cast %c1_i32_138 : i32 to index
    %c0_151 = arith.constant 0 : index
    %c0_152 = arith.constant 0 : index
    %394 = vector.load %arg7[%393, %c0_151, %c0_152] : memref<8x2x16xf32, #tpu.memory_space<vmem>>, vector<1x2x16xf32>
    %395 = vector.shape_cast %394 : vector<1x2x16xf32> to vector<2x16xf32>
    %396 = vector.shape_cast %392 : vector<2x16xf32> to vector<1x2x16xf32>
    tpu.vector_store %arg7[%393, %c0_151, %c0_152], %396 {strides = array<i32>} : memref<8x2x16xf32, #tpu.memory_space<vmem>>, vector<1x2x16xf32>,
    %c2_i32_153 = arith.constant 2 : i32
    %397 = arith.index_cast %c2_i32_153 : i32 to index
    %c0_154 = arith.constant 0 : index
    %c0_155 = arith.constant 0 : index
    %398 = vector.load %arg9[%397, %c0_154, %c0_155] : memref<8x2x32xf32, #tpu.memory_space<vmem>>, vector<1x2x32xf32>
    %399 = vector.shape_cast %398 : vector<1x2x32xf32> to vector<2x32xf32>
    %c0_156 = arith.constant 0 : index
    %c0_157 = arith.constant 0 : index
    %400 = vector.load %arg4[%c0_156, %c0_157] : memref<32x16xf32, #tpu.memory_space<vmem>>, vector<32x16xf32>
    %cst_158 = arith.constant dense<0.000000e+00> : vector<2x16xf32>
    %401 = tpu.matmul %399, %400, %cst_158 {dimension_numbers = #tpu.dot_dimension_numbers<[1], [0], [0], [1], [0, 0, 1, 1], [], []>} : vector<2x32xf32>, vector<32x16xf32>, vector<2x16xf32> -> vector<2x16xf32>
    %402 = arith.index_cast %c2_i32_153 : i32 to index
    %c0_159 = arith.constant 0 : index
    %c0_160 = arith.constant 0 : index
    %403 = vector.load %arg10[%402, %c0_159, %c0_160] : memref<8x2x32xf32, #tpu.memory_space<vmem>>, vector<1x2x32xf32>
    %404 = vector.shape_cast %403 : vector<1x2x32xf32> to vector<2x32xf32>
    %c0_161 = arith.constant 0 : index
    %c0_162 = arith.constant 0 : index
    %405 = vector.load %arg5[%c0_161, %c0_162] : memref<32x16xf32, #tpu.memory_space<vmem>>, vector<32x16xf32>
    %cst_163 = arith.constant dense<0.000000e+00> : vector<2x16xf32>
    %406 = tpu.matmul %404, %405, %cst_163 {dimension_numbers = #tpu.dot_dimension_numbers<[1], [0], [0], [1], [0, 0, 1, 1], [], []>} : vector<2x32xf32>, vector<32x16xf32>, vector<2x16xf32> -> vector<2x16xf32>
    %407 = arith.addf %401, %406 : vector<2x16xf32>
    %c0_164 = arith.constant 0 : index
    %c0_165 = arith.constant 0 : index
    %408 = vector.load %arg6[%c0_164, %c0_165] : memref<1x16xf32, #tpu.memory_space<vmem>>, vector<1x16xf32>
    %409 = vector.broadcast %408 : vector<1x16xf32> to vector<2x16xf32>
    %410 = arith.addf %407, %409 : vector<2x16xf32>
    %411 = arith.index_cast %c2_i32_153 : i32 to index
    %c0_166 = arith.constant 0 : index
    %c0_167 = arith.constant 0 : index
    %412 = vector.load %arg7[%411, %c0_166, %c0_167] : memref<8x2x16xf32, #tpu.memory_space<vmem>>, vector<1x2x16xf32>
    %413 = vector.shape_cast %412 : vector<1x2x16xf32> to vector<2x16xf32>
    %414 = vector.shape_cast %410 : vector<2x16xf32> to vector<1x2x16xf32>
    tpu.vector_store %arg7[%411, %c0_166, %c0_167], %414 {strides = array<i32>} : memref<8x2x16xf32, #tpu.memory_space<vmem>>, vector<1x2x16xf32>,
    %c3_i32_168 = arith.constant 3 : i32
    %415 = arith.index_cast %c3_i32_168 : i32 to index
    %c0_169 = arith.constant 0 : index
    %c0_170 = arith.constant 0 : index
    %416 = vector.load %arg9[%415, %c0_169, %c0_170] : memref<8x2x32xf32, #tpu.memory_space<vmem>>, vector<1x2x32xf32>
    %417 = vector.shape_cast %416 : vector<1x2x32xf32> to vector<2x32xf32>
    %c0_171 = arith.constant 0 : index
    %c0_172 = arith.constant 0 : index
    %418 = vector.load %arg4[%c0_171, %c0_172] : memref<32x16xf32, #tpu.memory_space<vmem>>, vector<32x16xf32>
    %cst_173 = arith.constant dense<0.000000e+00> : vector<2x16xf32>
    %419 = tpu.matmul %417, %418, %cst_173 {dimension_numbers = #tpu.dot_dimension_numbers<[1], [0], [0], [1], [0, 0, 1, 1], [], []>} : vector<2x32xf32>, vector<32x16xf32>, vector<2x16xf32> -> vector<2x16xf32>
    %420 = arith.index_cast %c3_i32_168 : i32 to index
    %c0_174 = arith.constant 0 : index
    %c0_175 = arith.constant 0 : index
    %421 = vector.load %arg10[%420, %c0_174, %c0_175] : memref<8x2x32xf32, #tpu.memory_space<vmem>>, vector<1x2x32xf32>
    %422 = vector.shape_cast %421 : vector<1x2x32xf32> to vector<2x32xf32>
    %c0_176 = arith.constant 0 : index
    %c0_177 = arith.constant 0 : index
    %423 = vector.load %arg5[%c0_176, %c0_177] : memref<32x16xf32, #tpu.memory_space<vmem>>, vector<32x16xf32>
    %cst_178 = arith.constant dense<0.000000e+00> : vector<2x16xf32>
    %424 = tpu.matmul %422, %423, %cst_178 {dimension_numbers = #tpu.dot_dimension_numbers<[1], [0], [0], [1], [0, 0, 1, 1], [], []>} : vector<2x32xf32>, vector<32x16xf32>, vector<2x16xf32> -> vector<2x16xf32>
    %425 = arith.addf %419, %424 : vector<2x16xf32>
    %c0_179 = arith.constant 0 : index
    %c0_180 = arith.constant 0 : index
    %426 = vector.load %arg6[%c0_179, %c0_180] : memref<1x16xf32, #tpu.memory_space<vmem>>, vector<1x16xf32>
    %427 = vector.broadcast %426 : vector<1x16xf32> to vector<2x16xf32>
    %428 = arith.addf %425, %427 : vector<2x16xf32>
    %429 = arith.index_cast %c3_i32_168 : i32 to index
    %c0_181 = arith.constant 0 : index
    %c0_182 = arith.constant 0 : index
    %430 = vector.load %arg7[%429, %c0_181, %c0_182] : memref<8x2x16xf32, #tpu.memory_space<vmem>>, vector<1x2x16xf32>
    %431 = vector.shape_cast %430 : vector<1x2x16xf32> to vector<2x16xf32>
    %432 = vector.shape_cast %428 : vector<2x16xf32> to vector<1x2x16xf32>
    tpu.vector_store %arg7[%429, %c0_181, %c0_182], %432 {strides = array<i32>} : memref<8x2x16xf32, #tpu.memory_space<vmem>>, vector<1x2x16xf32>,
    %c4_i32_183 = arith.constant 4 : i32
    %433 = arith.index_cast %c4_i32_183 : i32 to index
    %c0_184 = arith.constant 0 : index
    %c0_185 = arith.constant 0 : index
    %434 = vector.load %arg9[%433, %c0_184, %c0_185] : memref<8x2x32xf32, #tpu.memory_space<vmem>>, vector<1x2x32xf32>
    %435 = vector.shape_cast %434 : vector<1x2x32xf32> to vector<2x32xf32>
    %c0_186 = arith.constant 0 : index
    %c0_187 = arith.constant 0 : index
    %436 = vector.load %arg4[%c0_186, %c0_187] : memref<32x16xf32, #tpu.memory_space<vmem>>, vector<32x16xf32>
    %cst_188 = arith.constant dense<0.000000e+00> : vector<2x16xf32>
    %437 = tpu.matmul %435, %436, %cst_188 {dimension_numbers = #tpu.dot_dimension_numbers<[1], [0], [0], [1], [0, 0, 1, 1], [], []>} : vector<2x32xf32>, vector<32x16xf32>, vector<2x16xf32> -> vector<2x16xf32>
    %438 = arith.index_cast %c4_i32_183 : i32 to index
    %c0_189 = arith.constant 0 : index
    %c0_190 = arith.constant 0 : index
    %439 = vector.load %arg10[%438, %c0_189, %c0_190] : memref<8x2x32xf32, #tpu.memory_space<vmem>>, vector<1x2x32xf32>
    %440 = vector.shape_cast %439 : vector<1x2x32xf32> to vector<2x32xf32>
    %c0_191 = arith.constant 0 : index
    %c0_192 = arith.constant 0 : index
    %441 = vector.load %arg5[%c0_191, %c0_192] : memref<32x16xf32, #tpu.memory_space<vmem>>, vector<32x16xf32>
    %cst_193 = arith.constant dense<0.000000e+00> : vector<2x16xf32>
    %442 = tpu.matmul %440, %441, %cst_193 {dimension_numbers = #tpu.dot_dimension_numbers<[1], [0], [0], [1], [0, 0, 1, 1], [], []>} : vector<2x32xf32>, vector<32x16xf32>, vector<2x16xf32> -> vector<2x16xf32>
    %443 = arith.addf %437, %442 : vector<2x16xf32>
    %c0_194 = arith.constant 0 : index
    %c0_195 = arith.constant 0 : index
    %444 = vector.load %arg6[%c0_194, %c0_195] : memref<1x16xf32, #tpu.memory_space<vmem>>, vector<1x16xf32>
    %445 = vector.broadcast %444 : vector<1x16xf32> to vector<2x16xf32>
    %446 = arith.addf %443, %445 : vector<2x16xf32>
    %447 = arith.index_cast %c4_i32_183 : i32 to index
    %c0_196 = arith.constant 0 : index
    %c0_197 = arith.constant 0 : index
    %448 = vector.load %arg7[%447, %c0_196, %c0_197] : memref<8x2x16xf32, #tpu.memory_space<vmem>>, vector<1x2x16xf32>
    %449 = vector.shape_cast %448 : vector<1x2x16xf32> to vector<2x16xf32>
    %450 = vector.shape_cast %446 : vector<2x16xf32> to vector<1x2x16xf32>
    tpu.vector_store %arg7[%447, %c0_196, %c0_197], %450 {strides = array<i32>} : memref<8x2x16xf32, #tpu.memory_space<vmem>>, vector<1x2x16xf32>,
    %c5_i32_198 = arith.constant 5 : i32
    %451 = arith.index_cast %c5_i32_198 : i32 to index
    %c0_199 = arith.constant 0 : index
    %c0_200 = arith.constant 0 : index
    %452 = vector.load %arg9[%451, %c0_199, %c0_200] : memref<8x2x32xf32, #tpu.memory_space<vmem>>, vector<1x2x32xf32>
    %453 = vector.shape_cast %452 : vector<1x2x32xf32> to vector<2x32xf32>
    %c0_201 = arith.constant 0 : index
    %c0_202 = arith.constant 0 : index
    %454 = vector.load %arg4[%c0_201, %c0_202] : memref<32x16xf32, #tpu.memory_space<vmem>>, vector<32x16xf32>
    %cst_203 = arith.constant dense<0.000000e+00> : vector<2x16xf32>
    %455 = tpu.matmul %453, %454, %cst_203 {dimension_numbers = #tpu.dot_dimension_numbers<[1], [0], [0], [1], [0, 0, 1, 1], [], []>} : vector<2x32xf32>, vector<32x16xf32>, vector<2x16xf32> -> vector<2x16xf32>
    %456 = arith.index_cast %c5_i32_198 : i32 to index
    %c0_204 = arith.constant 0 : index
    %c0_205 = arith.constant 0 : index
    %457 = vector.load %arg10[%456, %c0_204, %c0_205] : memref<8x2x32xf32, #tpu.memory_space<vmem>>, vector<1x2x32xf32>
    %458 = vector.shape_cast %457 : vector<1x2x32xf32> to vector<2x32xf32>
    %c0_206 = arith.constant 0 : index
    %c0_207 = arith.constant 0 : index
    %459 = vector.load %arg5[%c0_206, %c0_207] : memref<32x16xf32, #tpu.memory_space<vmem>>, vector<32x16xf32>
    %cst_208 = arith.constant dense<0.000000e+00> : vector<2x16xf32>
    %460 = tpu.matmul %458, %459, %cst_208 {dimension_numbers = #tpu.dot_dimension_numbers<[1], [0], [0], [1], [0, 0, 1, 1], [], []>} : vector<2x32xf32>, vector<32x16xf32>, vector<2x16xf32> -> vector<2x16xf32>
    %461 = arith.addf %455, %460 : vector<2x16xf32>
    %c0_209 = arith.constant 0 : index
    %c0_210 = arith.constant 0 : index
    %462 = vector.load %arg6[%c0_209, %c0_210] : memref<1x16xf32, #tpu.memory_space<vmem>>, vector<1x16xf32>
    %463 = vector.broadcast %462 : vector<1x16xf32> to vector<2x16xf32>
    %464 = arith.addf %461, %463 : vector<2x16xf32>
    %465 = arith.index_cast %c5_i32_198 : i32 to index
    %c0_211 = arith.constant 0 : index
    %c0_212 = arith.constant 0 : index
    %466 = vector.load %arg7[%465, %c0_211, %c0_212] : memref<8x2x16xf32, #tpu.memory_space<vmem>>, vector<1x2x16xf32>
    %467 = vector.shape_cast %466 : vector<1x2x16xf32> to vector<2x16xf32>
    %468 = vector.shape_cast %464 : vector<2x16xf32> to vector<1x2x16xf32>
    tpu.vector_store %arg7[%465, %c0_211, %c0_212], %468 {strides = array<i32>} : memref<8x2x16xf32, #tpu.memory_space<vmem>>, vector<1x2x16xf32>,
    %c6_i32_213 = arith.constant 6 : i32
    %469 = arith.index_cast %c6_i32_213 : i32 to index
    %c0_214 = arith.constant 0 : index
    %c0_215 = arith.constant 0 : index
    %470 = vector.load %arg9[%469, %c0_214, %c0_215] : memref<8x2x32xf32, #tpu.memory_space<vmem>>, vector<1x2x32xf32>
    %471 = vector.shape_cast %470 : vector<1x2x32xf32> to vector<2x32xf32>
    %c0_216 = arith.constant 0 : index
    %c0_217 = arith.constant 0 : index
    %472 = vector.load %arg4[%c0_216, %c0_217] : memref<32x16xf32, #tpu.memory_space<vmem>>, vector<32x16xf32>
    %cst_218 = arith.constant dense<0.000000e+00> : vector<2x16xf32>
    %473 = tpu.matmul %471, %472, %cst_218 {dimension_numbers = #tpu.dot_dimension_numbers<[1], [0], [0], [1], [0, 0, 1, 1], [], []>} : vector<2x32xf32>, vector<32x16xf32>, vector<2x16xf32> -> vector<2x16xf32>
    %474 = arith.index_cast %c6_i32_213 : i32 to index
    %c0_219 = arith.constant 0 : index
    %c0_220 = arith.constant 0 : index
    %475 = vector.load %arg10[%474, %c0_219, %c0_220] : memref<8x2x32xf32, #tpu.memory_space<vmem>>, vector<1x2x32xf32>
    %476 = vector.shape_cast %475 : vector<1x2x32xf32> to vector<2x32xf32>
    %c0_221 = arith.constant 0 : index
    %c0_222 = arith.constant 0 : index
    %477 = vector.load %arg5[%c0_221, %c0_222] : memref<32x16xf32, #tpu.memory_space<vmem>>, vector<32x16xf32>
    %cst_223 = arith.constant dense<0.000000e+00> : vector<2x16xf32>
    %478 = tpu.matmul %476, %477, %cst_223 {dimension_numbers = #tpu.dot_dimension_numbers<[1], [0], [0], [1], [0, 0, 1, 1], [], []>} : vector<2x32xf32>, vector<32x16xf32>, vector<2x16xf32> -> vector<2x16xf32>
    %479 = arith.addf %473, %478 : vector<2x16xf32>
    %c0_224 = arith.constant 0 : index
    %c0_225 = arith.constant 0 : index
    %480 = vector.load %arg6[%c0_224, %c0_225] : memref<1x16xf32, #tpu.memory_space<vmem>>, vector<1x16xf32>
    %481 = vector.broadcast %480 : vector<1x16xf32> to vector<2x16xf32>
    %482 = arith.addf %479, %481 : vector<2x16xf32>
    %483 = arith.index_cast %c6_i32_213 : i32 to index
    %c0_226 = arith.constant 0 : index
    %c0_227 = arith.constant 0 : index
    %484 = vector.load %arg7[%483, %c0_226, %c0_227] : memref<8x2x16xf32, #tpu.memory_space<vmem>>, vector<1x2x16xf32>
    %485 = vector.shape_cast %484 : vector<1x2x16xf32> to vector<2x16xf32>
    %486 = vector.shape_cast %482 : vector<2x16xf32> to vector<1x2x16xf32>
    tpu.vector_store %arg7[%483, %c0_226, %c0_227], %486 {strides = array<i32>} : memref<8x2x16xf32, #tpu.memory_space<vmem>>, vector<1x2x16xf32>,
    %c7_i32_228 = arith.constant 7 : i32
    %487 = arith.index_cast %c7_i32_228 : i32 to index
    %c0_229 = arith.constant 0 : index
    %c0_230 = arith.constant 0 : index
    %488 = vector.load %arg9[%487, %c0_229, %c0_230] : memref<8x2x32xf32, #tpu.memory_space<vmem>>, vector<1x2x32xf32>
    %489 = vector.shape_cast %488 : vector<1x2x32xf32> to vector<2x32xf32>
    %c0_231 = arith.constant 0 : index
    %c0_232 = arith.constant 0 : index
    %490 = vector.load %arg4[%c0_231, %c0_232] : memref<32x16xf32, #tpu.memory_space<vmem>>, vector<32x16xf32>
    %cst_233 = arith.constant dense<0.000000e+00> : vector<2x16xf32>
    %491 = tpu.matmul %489, %490, %cst_233 {dimension_numbers = #tpu.dot_dimension_numbers<[1], [0], [0], [1], [0, 0, 1, 1], [], []>} : vector<2x32xf32>, vector<32x16xf32>, vector<2x16xf32> -> vector<2x16xf32>
    %492 = arith.index_cast %c7_i32_228 : i32 to index
    %c0_234 = arith.constant 0 : index
    %c0_235 = arith.constant 0 : index
    %493 = vector.load %arg10[%492, %c0_234, %c0_235] : memref<8x2x32xf32, #tpu.memory_space<vmem>>, vector<1x2x32xf32>
    %494 = vector.shape_cast %493 : vector<1x2x32xf32> to vector<2x32xf32>
    %c0_236 = arith.constant 0 : index
    %c0_237 = arith.constant 0 : index
    %495 = vector.load %arg5[%c0_236, %c0_237] : memref<32x16xf32, #tpu.memory_space<vmem>>, vector<32x16xf32>
    %cst_238 = arith.constant dense<0.000000e+00> : vector<2x16xf32>
    %496 = tpu.matmul %494, %495, %cst_238 {dimension_numbers = #tpu.dot_dimension_numbers<[1], [0], [0], [1], [0, 0, 1, 1], [], []>} : vector<2x32xf32>, vector<32x16xf32>, vector<2x16xf32> -> vector<2x16xf32>
    %497 = arith.addf %491, %496 : vector<2x16xf32>
    %c0_239 = arith.constant 0 : index
    %c0_240 = arith.constant 0 : index
    %498 = vector.load %arg6[%c0_239, %c0_240] : memref<1x16xf32, #tpu.memory_space<vmem>>, vector<1x16xf32>
    %499 = vector.broadcast %498 : vector<1x16xf32> to vector<2x16xf32>
    %500 = arith.addf %497, %499 : vector<2x16xf32>
    %501 = arith.index_cast %c7_i32_228 : i32 to index
    %c0_241 = arith.constant 0 : index
    %c0_242 = arith.constant 0 : index
    %502 = vector.load %arg7[%501, %c0_241, %c0_242] : memref<8x2x16xf32, #tpu.memory_space<vmem>>, vector<1x2x16xf32>
    %503 = vector.shape_cast %502 : vector<1x2x16xf32> to vector<2x16xf32>
    %504 = vector.shape_cast %500 : vector<2x16xf32> to vector<1x2x16xf32>
    tpu.vector_store %arg7[%501, %c0_241, %c0_242], %504 {strides = array<i32>} : memref<8x2x16xf32, #tpu.memory_space<vmem>>, vector<1x2x16xf32>,
    %c8_i32_243 = arith.constant 8 : i32
    return
  }
}

</mosaic_0001>

<bundles_post_ra>
// kernel: single_rnn_forward.1
= control target key start
LH: loop header
LB: loop body
LE: loop exit
PB: predicated region body
PF: predicated region fallthrough
CT: control target
= control target key end

     0   :  { %vm38_vm0 = vcmask 130048   ;;  %v1569_v22 = vmov 0.0   ;;  %v95_v30 = vlaneseq  ;;  %v1570_v50 = vmov 0.5   ;;  %s2210_s1 = inlined_call_operand.vmem [shape: f32[16,256], index: 1, kind: input, shape index: {}]   ;;  %s2211_s0 = inlined_call_operand.vmem [shape: f32[16,16], index: 0, kind: input, shape index: {}]   ;;  %s2212_s3 = inlined_call_operand.vmem [shape: f32[64,256], index: 3, kind: input, shape index: {}]   ;;  %s2213_s2 = inlined_call_operand.vmem [shape: f32[1,256], index: 2, kind: input, shape index: {}]   ;;  %s2214_s4 = inlined_call_operand.vmem [shape: f32[32,16], index: 4, kind: input, shape index: {}]   ;;  %s2215_s5 = inlined_call_operand.vmem [shape: f32[32,16], index: 5, kind: input, shape index: {}]   ;;  %s2216_s6 = inlined_call_operand.vmem [shape: f32[1,16], index: 6, kind: input, shape index: {}]   ;;  %s2217_s7 = inlined_call_operand.vmem [shape: f32[8,2,16], index: 7, kind: output, shape index: {}]  }
   0x1   :  { %v30_v0 = vld [vmem:[%s2210_s1 + $0x10] sm:$0xff]  ;;  %v31_v1 = vld [vmem:[%s2210_s1 + $0x18] sm:$0xff]  ;;  %v28_v2 = vld [vmem:[%s2210_s1] sm:$0xff]  ;;  %vm231_vm4 = vcmask 254976   ;;  %vm166_vm5 = vcmask 523264   ;;  %vm969_vm6 = vcmask 261120  }
   0x2   :  { %59 = vmatpush.msra.mxu0 %v30_v0  ;;  %82 = vmatpush.msra.mxu1 %v31_v1  ;;  %v29_v3 = vld [vmem:[%s2210_s1 + $0x8] sm:$0xff]  ;;  %v26_v4 = vld [vmem:[%s2211_s0] sm:$0xff]  ;;  %v1631_v5 = vld [vmem:[%s2212_s3 + $0x70] sm:$0xff]  ;;  %v96_v35 = vand.u32 127, %v95_v30  ;;  %vm1021_vm7 = vcmask 123904  }
   0x3   :  { %178 = vmatpush.msra.mxu2 %v1631_v5  ;;  %v1637_v6 = vld [vmem:[%s2212_s3 + $0x78] sm:$0xff]  ;;  %v1642_v7 = vld [vmem:[%s2212_s3 + $0x60] sm:$0xff]  ;;  %v1649_v8 = vld [vmem:[%s2212_s3 + $0x68] sm:$0xff] }
   0x4   :  { %60 = vmatpush.msra.mxu0 %v28_v2  ;;  %83 = vmatpush.msra.mxu1 %v29_v3  ;;  %v1654_v9 = vld [vmem:[%s2212_s3 + $0x50] sm:$0xff]  ;;  %v1661_v10 = vld [vmem:[%s2212_s3 + $0x58] sm:$0xff]  ;;  %v1666_v11 = vld [vmem:[%s2212_s3 + $0x40] sm:$0xff]  ;;  %v97_v36 = vadd.s32 128, %v96_v35  ;;  %v102_v37 = vand.u32 63, %v96_v35 }
   0x5   :  { %1468 = vmatmul.msk.f32.vlgmr.msra.gmra.mxu0 %vm38_vm0, %v26_v4  ;;  %1470 = vmatmul.msk.f32.vlgmr.msra.gmra.mxu1 %vm38_vm0, %v26_v4  ;;  %v1675_v12 = vld [vmem:[%s2212_s3 + $0x48] sm:$0xff]  ;;  %v1680_v13 = vld [vmem:[%s2212_s3 + $0x30] sm:$0xff]  ;;  %v1692_v15 = vld [vmem:[%s2212_s3 + $0x38] sm:$0xff] }
   0x6   :  { %198 = vmatpush.msra.mxu3 %v1637_v6  ;;  %179 = vmatpush.msra.mxu2 %v1642_v7  ;;  %v27_v14 = vld [vmem:[%s2211_s0 + $0x8] sm:$0xff]  ;;  %v1697_v16 = vld [vmem:[%s2212_s3 + $0x20] sm:$0xff]  ;;  %v1713_v18 = vld [vmem:[%s2212_s3 + $0x10] sm:$0xff]  ;;  %v109_v38 = vand.u32 63, %v97_v36  ;;  %vm127_vm1 = vcmp.lt.s32.totalorder %v97_v36, 192  ;;  %vm1798_vm2 = vcmp.lt.s32.totalorder %v102_v37, 32 }
   0x7   :  { %282 = vmatpush.msrb.mxu0 %v1631_v5  ;;  %302 = vmatpush.msrb.mxu1 %v1637_v6  ;;  %v1708_v17 = vld [vmem:[%s2212_s3 + $0x28] sm:$0xff]  ;;  %v1720_v19 = vld [vmem:[%s2212_s3 + $0x18] sm:$0xff]  ;;  %v1725_v20 = vld [vmem:[%s2212_s3] sm:$0xff]  ;;  %v1809_v51 = vsel %vm127_vm1, 1.0, %v1570_v50  ;;  %v1815_v60 = vsel %vm127_vm1, 0.0, %v1570_v50  ;;  %s1572_s0 = smov 32  }
   0x8   :  { %199 = vmatpush.msra.mxu3 %v1649_v8  ;;  %180 = vmatpush.msra.mxu2 %v1654_v9  ;;  %v1734_v21 = vld [vmem:[%s2212_s3 + $0x8] sm:$0xff]  ;;  %v32_v23 = vld [vmem:[%s2213_s2] sm:$0x3]  ;;  %vm1804_vm3 = vcmp.lt.s32.totalorder %v109_v38, 32  ;;  %s1571_s2 = smov 64  }
   0x9   :  { %283 = vmatpush.msrb.mxu0 %v1642_v7  ;;  %303 = vmatpush.msrb.mxu1 %v1649_v8  ;;  %v34_v24 = vperm.slane %v32_v23, 0  ;;  %v35_v25 = vperm.slane %v32_v23, 1  ;;  %v1513_v47 = vld [vmem:[%s2216_s6] ss:$0 sm:$0xff] }
   0xa   :  { %200 = vmatpush.msra.mxu3 %v1661_v10  ;;  %181 = vmatpush.msra.mxu2 %v1666_v11 }
   0xb   :  { %284 = vmatpush.msrb.mxu0 %v1654_v9  ;;  %304 = vmatpush.msrb.mxu1 %v1661_v10 }
   0xc   :  { %201 = vmatpush.msra.mxu3 %v1675_v12  ;;  %182 = vmatpush.msra.mxu2 %v1680_v13 }
   0xd   :  { %1469 = vmatmul.msk.f32.gmra.mxu0 %vm38_vm0, %v27_v14  ;;  %1471 = vmatmul.msk.f32.gmra.mxu1 %vm38_vm0, %v27_v14 }
   0xe   :  { %202 = vmatpush.msra.mxu3 %v1692_v15  ;;  %183 = vmatpush.msra.mxu2 %v1697_v16 }
   0xf   :  { %285 = vmatpush.msrb.mxu0 %v1666_v11  ;;  %305 = vmatpush.msrb.mxu1 %v1675_v12 }
  0x10   :  { %203 = vmatpush.msra.mxu3 %v1708_v17  ;;  %184 = vmatpush.msra.mxu2 %v1713_v18 }
  0x11   :  { %286 = vmatpush.msrb.mxu0 %v1680_v13  ;;  %306 = vmatpush.msrb.mxu1 %v1692_v15 }
  0x12   :  { %204 = vmatpush.msra.mxu3 %v1720_v19  ;;  %185 = vmatpush.msra.mxu2 %v1725_v20 }
  0x13   :  { %186 = vmatmul.f32.vlgmr.msra.gmra.mxu2 %v1569_v22  ;;  %287 = vmatpush.msrb.mxu0 %v1697_v16 }
  0x14   :  { %205 = vmatpush.msra.mxu3 %v1734_v21  ;;  %307 = vmatpush.msrb.mxu1 %v1708_v17 }
  0x15   :  { %206 = vmatmul.f32.vlgmr.msra.gmra.mxu3 %v1569_v22  ;;  %288 = vmatpush.msrb.mxu0 %v1713_v18 }
  0x16   :  { %308 = vmatpush.msrb.mxu1 %v1720_v19  ;;  %386 = vmatpush.msrb.mxu2 %v1631_v5 }
  0x17   :  { %289 = vmatpush.msrb.mxu0 %v1725_v20  ;;  %406 = vmatpush.msrb.mxu3 %v1637_v6 }
  0x18   :  { %309 = vmatpush.msrb.mxu1 %v1734_v21  ;;  %387 = vmatpush.msrb.mxu2 %v1642_v7 }
  0x19   :  { %407 = vmatpush.msrb.mxu3 %v1649_v8  ;;  %490 = vmatpush.msra.mxu0 %v1631_v5 }
  0x1a   :  { %388 = vmatpush.msrb.mxu2 %v1654_v9  ;;  %510 = vmatpush.msra.mxu1 %v1637_v6 }
  0x1b   :  { %408 = vmatpush.msrb.mxu3 %v1661_v10  ;;  %491 = vmatpush.msra.mxu0 %v1642_v7 }
  0x1c   :  { %389 = vmatpush.msrb.mxu2 %v1666_v11  ;;  %511 = vmatpush.msra.mxu1 %v1649_v8 }
  0x1d   :  { %409 = vmatpush.msrb.mxu3 %v1675_v12  ;;  %492 = vmatpush.msra.mxu0 %v1654_v9 }
  0x1e   :  { %390 = vmatpush.msrb.mxu2 %v1680_v13  ;;  %512 = vmatpush.msra.mxu1 %v1661_v10 }
  0x1f   :  { %410 = vmatpush.msrb.mxu3 %v1692_v15  ;;  %493 = vmatpush.msra.mxu0 %v1666_v11 }
  0x20   :  { %391 = vmatpush.msrb.mxu2 %v1697_v16  ;;  %513 = vmatpush.msra.mxu1 %v1675_v12 }
  0x21   :  { %411 = vmatpush.msrb.mxu3 %v1708_v17  ;;  %494 = vmatpush.msra.mxu0 %v1680_v13 }
  0x22   :  { %392 = vmatpush.msrb.mxu2 %v1713_v18  ;;  %514 = vmatpush.msra.mxu1 %v1692_v15 }
  0x23   :  { %412 = vmatpush.msrb.mxu3 %v1720_v19  ;;  %495 = vmatpush.msra.mxu0 %v1697_v16 }
  0x24   :  { %393 = vmatpush.msrb.mxu2 %v1725_v20  ;;  %515 = vmatpush.msra.mxu1 %v1708_v17 }
  0x25   :  { %413 = vmatpush.msrb.mxu3 %v1734_v21  ;;  %496 = vmatpush.msra.mxu0 %v1713_v18 }
  0x26   :  { %516 = vmatpush.msra.mxu1 %v1720_v19  ;;  %588 = vmatpush.msra.mxu2 %v1631_v5 }
  0x27   :  { %497 = vmatpush.msra.mxu0 %v1725_v20  ;;  %608 = vmatpush.msra.mxu3 %v1637_v6 }
  0x28   :  { %517 = vmatpush.msra.mxu1 %v1734_v21  ;;  %589 = vmatpush.msra.mxu2 %v1642_v7 }
  0x29   :  { %609 = vmatpush.msra.mxu3 %v1649_v8 }
  0x2a   :  { %590 = vmatpush.msra.mxu2 %v1654_v9 }
  0x2b   :  { %610 = vmatpush.msra.mxu3 %v1661_v10 }
  0x2c   :  { %591 = vmatpush.msra.mxu2 %v1666_v11 }
  0x2d   :  { %611 = vmatpush.msra.mxu3 %v1675_v12 }
  0x2e   :  { %592 = vmatpush.msra.mxu2 %v1680_v13 }
  0x2f   :  { %612 = vmatpush.msra.mxu3 %v1692_v15 }
  0x30   :  { %593 = vmatpush.msra.mxu2 %v1697_v16 }
  0x31   :  { %613 = vmatpush.msra.mxu3 %v1708_v17 }
  0x32   :  { %594 = vmatpush.msra.mxu2 %v1713_v18 }
  0x33   :  { %614 = vmatpush.msra.mxu3 %v1720_v19 }
  0x34   :  { %595 = vmatpush.msra.mxu2 %v1725_v20 }
  0x35   :  { %615 = vmatpush.msra.mxu3 %v1734_v21 }
  0x82   :  { %v62_v26 = vpop.f32.mrf.mxu0  ;;  %v85_v27 = vpop.f32.mrf.mxu1 }
  0x83   :  { %v63_v28 = vadd.f32 %v62_v26, %v34_v24  ;;  %v86_v29 = vadd.f32 %v85_v27, %v35_v25 }
  0x85   :  { %91 = vst [vmem:[#allocation2 + $0x10] sm:$0xff] %v63_v28 }
  0x86   :  { %92 = vst [vmem:[#allocation2] sm:$0xff] %v86_v29 }
  0x8a   :  { %v65_v31 = vpop.f32.mrf.mxu0  ;;  %v88_v32 = vpop.f32.mrf.mxu1 }
  0x8b   :  { %v66_v33 = vadd.f32 %v65_v31, %v34_v24  ;;  %v89_v34 = vadd.f32 %v88_v32, %v35_v25 }
  0x8c   :  { %v150_v43 = vld [vmem:[#allocation2 + $0x10] sm:$0x3]  ;;  %v254_v27 = vld [vmem:[#allocation2 + $0x10] sm:$0xc] }
  0x8d   :  { %93 = vst [vmem:[#allocation2 + $0x18] sm:$0xff] %v66_v33  ;;  %v151_v48 = vld [vmem:[#allocation2] sm:$0x3]  ;;  %v255_v28 = vld [vmem:[#allocation2] sm:$0xc] }
  0x8e   :  { %94 = vst [vmem:[#allocation2 + $0x8] sm:$0xff] %v89_v34 }
  0x94   :  { %v152_v39 = vld [vmem:[#allocation2 + $0x18] sm:$0xc0]  ;;  %v256_v23 = vld [vmem:[#allocation2 + $0x18] sm:$0x30] }
  0x95   :  { %v160_v40 = vrot.slane %v152_v39, 6  ;;  %v153_v41 = vld [vmem:[#allocation2 + $0x8] sm:$0xc0]  ;;  %v257_v24 = vld [vmem:[#allocation2 + $0x8] sm:$0x30]  ;;  %v260_v25 = vrot.slane %v256_v23, 2 }
  0x96   :  { %v187_v44 = vpop.f32.mrf.mxu2  ;;  %v161_v45 = vrot.slane %v153_v41, 6  ;;  %v261_v26 = vrot.slane %v257_v24, 2  ;;  %v465_v23 = vld [vmem:[#allocation2 + $0x8] sm:$0x3] }
  0x97   :  { %v164_v46 = vsel %vm1798_vm2, %v150_v43, %v160_v40  ;;  %v264_v29 = vsel %vm1798_vm2, %v254_v27, %v260_v25  ;;  %v469_v25 = vrot.slane %v465_v23, 2  ;;  %v463_v27 = vld [vmem:[#allocation2] sm:$0xc0]  ;;  %v664_v23 = vld [vmem:[#allocation2 + $0x18] sm:$0xc] }
  0x98   :  { %v188_v49 = vadd.f32 %v187_v44, %v164_v46  ;;  %v165_v52 = vsel %vm1804_vm3, %v151_v48, %v161_v45  ;;  %v207_v53 = vpop.f32.mrf.mxu3  ;;  %v265_v30 = vsel %vm1804_vm3, %v255_v28, %v261_v26  ;;  %v268_v31 = vrot.slane %v264_v29, 2  ;;  %v462_v26 = vld [vmem:[#allocation2 + $0x10] sm:$0xc0] }
  0x99   :  { %v208_v54 = vadd.f32 %v207_v53, %v165_v52  ;;  %v269_v32 = vrot.slane %v265_v30, 2  ;;  %v473_v29 = vsel %vm1804_vm3, %v463_v27, %v469_v25 }
  0x9a   :  { %v210_v55 = vmul.f32 0.5, %v188_v49 }
  0x9b   :  { %v211_v56 = vmul.f32 %v208_v54, %v1809_v51 }
  0x9c   :  { %1521 = vtanh.f32 %v210_v55 }
  0x9d   :  { %1523 = vtanh.f32 %v211_v56 }
  0xa2   :  { %v1522_v57 = vpop.eup %1521 }
  0xa3   :  { %v1524_v58 = vpop.eup %1523  ;;  %v214_v59 = vmul.f32 0.5, %v1522_v57 }
  0xa4   :  { %v215_v61 = vmul.f32 %v1524_v58, %v1809_v51 }
  0xa5   :  { %v216_v62 = vadd.f32 0.5, %v214_v59 }
  0xa6   :  { %v217_v63 = vadd.f32 %v215_v61, %v1815_v60 }
  0xa7   :  { %v218_v1 = vmul.f32 0.0, %v216_v62 }
  0xa8   :  { %v219_v0 = vmul.f32 %v217_v63, %v216_v62 }
  0xaa   :  { %221 = vrot.lane.b32.xlu0 %v219_v0, %s1571_s2 }
 0x11c   :  { %v222_v2 = vpop.permute.xlu0 %221 }
 0x11d   :  { %v224_v3 = vadd.f32 %v222_v2, %v218_v1 }
 0x11f   :  { %1525 = vtanh.f32 %v224_v3 }
 0x125   :  { %v1526_v4 = vpop.eup %1525 }
 0x126   :  { %v1820_v14 = vmul.f32 %v1526_v4, %v217_v63 }
 0x128   :  { %228 = vrot.lane.b32.xlu0 %v1820_v14, %s1571_s2 }
 0x19a   :  { %v229_v22 = vpop.permute.xlu0 %228 }
 0x19b   :  { %232 = vst.msk [vmem:[#allocation3] sm:$0x3] %vm231_vm4, %v229_v22  ;;  %1472 = vmatmul.msk.f32.vlgmr.msrb.gmra.mxu0 %vm166_vm5, %v229_v22  ;;  %1473 = vmatmul.msk.f32.vlgmr.msrb.gmra.mxu1 %vm166_vm5, %v229_v22  ;;  %v464_v22 = vld [vmem:[#allocation2 + $0x18] sm:$0x3] }
 0x19c   :  { %692 = vmatpush.msrb.mxu0 %v1631_v5  ;;  %712 = vmatpush.msrb.mxu1 %v1637_v6  ;;  %v468_v24 = vrot.slane %v464_v22, 2  ;;  %v667_v22 = vld [vmem:[#allocation2] sm:$0x30] }
 0x19e   :  { %693 = vmatpush.msrb.mxu0 %v1642_v7  ;;  %713 = vmatpush.msrb.mxu1 %v1649_v8  ;;  %v472_v28 = vsel %vm1798_vm2, %v462_v26, %v468_v24  ;;  %v665_v24 = vld [vmem:[#allocation2 + $0x8] sm:$0xc]  ;;  %v671_v26 = vrot.slane %v667_v22, 2 }
 0x19f   :  { %v476_v30 = vrot.slane %v472_v28, 6 }
 0x1a0   :  { %694 = vmatpush.msrb.mxu0 %v1654_v9  ;;  %714 = vmatpush.msrb.mxu1 %v1661_v10  ;;  %v675_v28 = vsel %vm1804_vm3, %v665_v24, %v671_v26 }
 0x1a2   :  { %695 = vmatpush.msrb.mxu0 %v1666_v11  ;;  %715 = vmatpush.msrb.mxu1 %v1675_v12 }
 0x1a4   :  { %696 = vmatpush.msrb.mxu0 %v1680_v13  ;;  %716 = vmatpush.msrb.mxu1 %v1692_v15 }
 0x1a6   :  { %697 = vmatpush.msrb.mxu0 %v1697_v16  ;;  %717 = vmatpush.msrb.mxu1 %v1708_v17 }
 0x1a8   :  { %698 = vmatpush.msrb.mxu0 %v1713_v18  ;;  %718 = vmatpush.msrb.mxu1 %v1720_v19 }
 0x1aa   :  { %699 = vmatpush.msrb.mxu0 %v1725_v20  ;;  %719 = vmatpush.msrb.mxu1 %v1734_v21 }
 0x218   :  { %v291_v33 = vpop.f32.mrf.mxu0  ;;  %v311_v34 = vpop.f32.mrf.mxu1 }
 0x219   :  { %v292_v35 = vadd.f32 %v291_v33, %v268_v31  ;;  %v312_v36 = vadd.f32 %v311_v34, %v269_v32  ;;  %v477_v31 = vrot.slane %v473_v29, 6 }
 0x21b   :  { %v314_v37 = vmul.f32 0.5, %v292_v35  ;;  %v315_v38 = vmul.f32 %v312_v36, %v1809_v51 }
 0x21d   :  { %1527 = vtanh.f32 %v314_v37 }
 0x21e   :  { %1529 = vtanh.f32 %v315_v38 }
 0x223   :  { %v1528_v39 = vpop.eup %1527 }
 0x224   :  { %v1530_v40 = vpop.eup %1529  ;;  %v318_v41 = vmul.f32 0.5, %v1528_v39 }
 0x225   :  { %v319_v43 = vmul.f32 %v1530_v40, %v1809_v51 }
 0x226   :  { %v320_v44 = vadd.f32 0.5, %v318_v41 }
 0x227   :  { %v321_v45 = vadd.f32 %v319_v43, %v1815_v60 }
 0x228   :  { %v322_v48 = vmul.f32 %v320_v44, %v224_v3 }
 0x229   :  { %v323_v46 = vmul.f32 %v321_v45, %v320_v44 }
 0x22b   :  { %325 = vrot.lane.b32.xlu1 %v323_v46, %s1571_s2 }
 0x29d   :  { %v326_v49 = vpop.permute.xlu1 %325 }
 0x29e   :  { %v328_v50 = vadd.f32 %v326_v49, %v322_v48 }
 0x2a0   :  { %1531 = vtanh.f32 %v328_v50 }
 0x2a6   :  { %v1532_v52 = vpop.eup %1531 }
 0x2a7   :  { %v1851_v53 = vmul.f32 %v1532_v52, %v321_v45 }
 0x2a9   :  { %332 = vrot.lane.b32.xlu1 %v1851_v53, %s1571_s2 }
 0x31b   :  { %v333_v54 = vpop.permute.xlu1 %332 }
 0x31c   :  { %336 = vst.msk [vmem:[#allocation3 + $0x2] sm:$0x3] %vm231_vm4, %v333_v54  ;;  %1474 = vmatmul.msk.f32.vlgmr.msrb.gmra.mxu2 %vm166_vm5, %v333_v54  ;;  %1475 = vmatmul.msk.f32.vlgmr.msrb.gmra.mxu3 %vm166_vm5, %v333_v54 }
 0x31d   :  { %796 = vmatpush.msrb.mxu2 %v1631_v5  ;;  %816 = vmatpush.msrb.mxu3 %v1637_v6  ;;  %v360_v5 = vld [vmem:[#allocation2 + $0x18] sm:$0xc]  ;;  %v361_v6 = vld [vmem:[#allocation2 + $0x8] sm:$0xc] }
 0x31f   :  { %797 = vmatpush.msrb.mxu2 %v1642_v7  ;;  %817 = vmatpush.msrb.mxu3 %v1649_v8  ;;  %v364_v7 = vrot.slane %v360_v5, 6  ;;  %v365_v8 = vrot.slane %v361_v6, 6  ;;  %v568_v5 = vld [vmem:[#allocation2 + $0x10] sm:$0xc0]  ;;  %v569_v6 = vld [vmem:[#allocation2] sm:$0xc0] }
 0x321   :  { %798 = vmatpush.msrb.mxu2 %v1654_v9  ;;  %818 = vmatpush.msrb.mxu3 %v1661_v10  ;;  %v358_v9 = vld [vmem:[#allocation2 + $0x10] sm:$0x30]  ;;  %v359_v10 = vld [vmem:[#allocation2] sm:$0x30] }
 0x323   :  { %799 = vmatpush.msrb.mxu2 %v1666_v11  ;;  %819 = vmatpush.msrb.mxu3 %v1675_v12  ;;  %v368_v11 = vsel %vm1798_vm2, %v358_v9, %v364_v7  ;;  %v369_v12 = vsel %vm1804_vm3, %v359_v10, %v365_v8  ;;  %v566_v7 = vld [vmem:[#allocation2 + $0x18] sm:$0x3]  ;;  %v567_v8 = vld [vmem:[#allocation2 + $0x8] sm:$0x3]  ;;  %v572_v9 = vrot.slane %v568_v5, 6  ;;  %v573_v10 = vrot.slane %v569_v6, 6 }
 0x324   :  { %v1942_v5 = vld [vmem:[%s2214_s4 + $0x10] sm:$0xff]  ;;  %v1948_v6 = vld [vmem:[%s2214_s4 + $0x8] sm:$0xff] }
 0x325   :  { %800 = vmatpush.msrb.mxu2 %v1680_v13  ;;  %820 = vmatpush.msrb.mxu3 %v1692_v15  ;;  %v372_v13 = vrot.slane %v368_v11, 4  ;;  %v373_v15 = vrot.slane %v369_v12, 4  ;;  %v576_v11 = vsel %vm1798_vm2, %v566_v7, %v572_v9  ;;  %v1954_v7 = vld [vmem:[%s2214_s4] sm:$0xff] }
 0x326   :  { %v959_v9 = vld [vmem:[#allocation3] sm:$0x3] }
 0x327   :  { %801 = vmatpush.msrb.mxu2 %v1697_v16  ;;  %821 = vmatpush.msrb.mxu3 %v1708_v17 }
 0x329   :  { %802 = vmatpush.msrb.mxu2 %v1713_v18  ;;  %822 = vmatpush.msrb.mxu3 %v1720_v19 }
 0x32b   :  { %803 = vmatpush.msrb.mxu2 %v1725_v20  ;;  %823 = vmatpush.msrb.mxu3 %v1734_v21 }
 0x39f   :  { %v395_v16 = vpop.f32.mrf.mxu2  ;;  %v415_v17 = vpop.f32.mrf.mxu3 }
 0x3a0   :  { %v396_v18 = vadd.f32 %v395_v16, %v372_v13  ;;  %v416_v19 = vadd.f32 %v415_v17, %v373_v15  ;;  %v577_v13 = vsel %vm1804_vm3, %v567_v8, %v573_v10 }
 0x3a2   :  { %v418_v20 = vmul.f32 0.5, %v396_v18  ;;  %v419_v21 = vmul.f32 %v416_v19, %v1809_v51 }
 0x3a4   :  { %1533 = vtanh.f32 %v418_v20 }
 0x3a5   :  { %1535 = vtanh.f32 %v419_v21 }
 0x3aa   :  { %v1534_v55 = vpop.eup %1533 }
 0x3ab   :  { %v1536_v56 = vpop.eup %1535  ;;  %v422_v57 = vmul.f32 0.5, %v1534_v55 }
 0x3ac   :  { %v423_v58 = vmul.f32 %v1536_v56, %v1809_v51 }
 0x3ad   :  { %v424_v59 = vadd.f32 0.5, %v422_v57 }
 0x3ae   :  { %v425_v61 = vadd.f32 %v423_v58, %v1815_v60 }
 0x3af   :  { %v426_v63 = vmul.f32 %v424_v59, %v328_v50 }
 0x3b0   :  { %v427_v62 = vmul.f32 %v425_v61, %v424_v59 }
 0x3b2   :  { %429 = vrot.lane.b32.xlu2 %v427_v62, %s1571_s2 }
 0x40c   :  { %v430_v0 = vpop.permute.xlu2 %429 }
 0x40d   :  { %v432_v1 = vadd.f32 %v430_v0, %v426_v63 }
 0x40f   :  { %1537 = vtanh.f32 %v432_v1 }
 0x415   :  { %v1538_v2 = vpop.eup %1537 }
 0x416   :  { %v1882_v3 = vmul.f32 %v1538_v2, %v425_v61 }
 0x418   :  { %436 = vrot.lane.b32.xlu2 %v1882_v3, %s1571_s2 }
 0x472   :  { %v437_v4 = vpop.permute.xlu2 %436 }
 0x473   :  { %440 = vst.msk [vmem:[#allocation3 + $0x4] sm:$0x3] %vm231_vm4, %v437_v4  ;;  %1476 = vmatmul.msk.f32.vlgmr.msra.gmra.mxu0 %vm166_vm5, %v437_v4  ;;  %1477 = vmatmul.msk.f32.vlgmr.msra.gmra.mxu1 %vm166_vm5, %v437_v4  ;;  %v666_v4 = vld [vmem:[#allocation2 + $0x10] sm:$0x30] }
 0x474   :  { %v670_v25 = vrot.slane %v666_v4, 2 }
 0x476   :  { %v674_v27 = vsel %vm1798_vm2, %v664_v23, %v670_v25 }
 0x477   :  { %v678_v29 = vrot.slane %v674_v27, 2 }
 0x47a   :  { %v1086_v10 = vld [vmem:[#allocation3 + $0x4] sm:$0x3] }
 0x4f0   :  { %v499_v32 = vpop.f32.mrf.mxu0  ;;  %v519_v33 = vpop.f32.mrf.mxu1 }
 0x4f1   :  { %v500_v34 = vadd.f32 %v499_v32, %v476_v30  ;;  %v520_v35 = vadd.f32 %v519_v33, %v477_v31  ;;  %v679_v30 = vrot.slane %v675_v28, 2  ;;  %v870_v28 = vld [vmem:[%s2212_s3 + $0x70] sm:$0xff] }
 0x4f2   :  { %900 = vmatpush.msra.mxu0 %v870_v28 }
 0x4f3   :  { %v522_v36 = vmul.f32 0.5, %v500_v34  ;;  %v523_v37 = vmul.f32 %v520_v35, %v1809_v51 }
 0x4f5   :  { %1539 = vtanh.f32 %v522_v36 }
 0x4f6   :  { %1541 = vtanh.f32 %v523_v37 }
 0x4fb   :  { %v1540_v38 = vpop.eup %1539 }
 0x4fc   :  { %v1542_v39 = vpop.eup %1541  ;;  %v526_v40 = vmul.f32 0.5, %v1540_v38 }
 0x4fd   :  { %v527_v41 = vmul.f32 %v1542_v39, %v1809_v51 }
 0x4fe   :  { %v528_v43 = vadd.f32 0.5, %v526_v40 }
 0x4ff   :  { %v529_v44 = vadd.f32 %v527_v41, %v1815_v60 }
 0x500   :  { %v530_v46 = vmul.f32 %v528_v43, %v432_v1 }
 0x501   :  { %v531_v45 = vmul.f32 %v529_v44, %v528_v43 }
 0x503   :  { %533 = vrot.lane.b32.xlu0 %v531_v45, %s1571_s2 }
 0x575   :  { %v534_v48 = vpop.permute.xlu0 %533 }
 0x576   :  { %v536_v49 = vadd.f32 %v534_v48, %v530_v46 }
 0x578   :  { %1543 = vtanh.f32 %v536_v49 }
 0x57e   :  { %v1544_v50 = vpop.eup %1543 }
 0x57f   :  { %v1897_v52 = vmul.f32 %v1544_v50, %v529_v44 }
 0x581   :  { %540 = vrot.lane.b32.xlu1 %v1897_v52, %s1571_s2 }
 0x5f3   :  { %v541_v54 = vpop.permute.xlu1 %540 }
 0x5f4   :  { %544 = vst.msk [vmem:[#allocation3 + $0x6] sm:$0x3] %vm231_vm4, %v541_v54  ;;  %1478 = vmatmul.msk.f32.vlgmr.msra.gmra.mxu2 %vm166_vm5, %v541_v54  ;;  %1479 = vmatmul.msk.f32.vlgmr.msra.gmra.mxu3 %vm166_vm5, %v541_v54  ;;  %v1937_v54 = vld [vmem:[%s2214_s4 + $0x18] sm:$0xff] }
 0x5f5   :  { %1008 = vmatpush.msra.mxu3 %v1937_v54 }
 0x5f7   :  { %1009 = vmatpush.msra.mxu3 %v1942_v5 }
 0x5f9   :  { %1010 = vmatpush.msra.mxu3 %v1948_v6 }
 0x5fb   :  { %1011 = vmatpush.msra.mxu3 %v1954_v7 }
 0x677   :  { %v597_v12 = vpop.f32.mrf.mxu2  ;;  %v617_v15 = vpop.f32.mrf.mxu3 }
 0x678   :  { %v598_v16 = vadd.f32 %v597_v12, %v576_v11  ;;  %v618_v17 = vadd.f32 %v617_v15, %v577_v13  ;;  %v770_v12 = vld [vmem:[#allocation2 + $0x10] sm:$0xc]  ;;  %v771_v13 = vld [vmem:[#allocation2] sm:$0xc]  ;;  %v768_v15 = vld [vmem:[#allocation2 + $0x18] sm:$0x30] }
 0x67a   :  { %v620_v18 = vmul.f32 0.5, %v598_v16  ;;  %v621_v19 = vmul.f32 %v618_v17, %v1809_v51  ;;  %v769_v16 = vld [vmem:[#allocation2 + $0x8] sm:$0x30]  ;;  %v774_v17 = vrot.slane %v770_v12, 6 }
 0x67c   :  { %1545 = vtanh.f32 %v620_v18  ;;  %v775_v18 = vrot.slane %v771_v13, 6 }
 0x67d   :  { %1547 = vtanh.f32 %v621_v19  ;;  %v778_v19 = vsel %vm1798_vm2, %v768_v15, %v774_v17  ;;  %v1149_v15 = vld [vmem:[#allocation3 + $0x6] sm:$0x3] }
 0x682   :  { %v1546_v20 = vpop.eup %1545 }
 0x683   :  { %v1548_v21 = vpop.eup %1547  ;;  %v624_v55 = vmul.f32 0.5, %v1546_v20  ;;  %v779_v20 = vsel %vm1804_vm3, %v769_v16, %v775_v18  ;;  %v875_v18 = vld [vmem:[#allocation2] sm:$0x3] }
 0x684   :  { %v625_v56 = vmul.f32 %v1548_v21, %v1809_v51  ;;  %v782_v21 = vrot.slane %v778_v19, 4  ;;  %v872_v19 = vld [vmem:[#allocation2 + $0x18] sm:$0xc0] }
 0x685   :  { %v626_v57 = vadd.f32 0.5, %v624_v55  ;;  %v783_v55 = vrot.slane %v779_v20, 4 }
 0x686   :  { %v627_v58 = vadd.f32 %v625_v56, %v1815_v60 }
 0x687   :  { %v628_v61 = vmul.f32 %v626_v57, %v536_v49 }
 0x688   :  { %v629_v59 = vmul.f32 %v627_v58, %v626_v57 }
 0x68a   :  { %631 = vrot.lane.b32.xlu2 %v629_v59, %s1571_s2 }
 0x6e4   :  { %v632_v62 = vpop.permute.xlu2 %631 }
 0x6e5   :  { %v634_v63 = vadd.f32 %v632_v62, %v628_v61 }
 0x6e7   :  { %1549 = vtanh.f32 %v634_v63 }
 0x6ed   :  { %v1550_v0 = vpop.eup %1549 }
 0x6ee   :  { %v1912_v1 = vmul.f32 %v1550_v0, %v627_v58 }
 0x6f0   :  { %638 = vrot.lane.b32.xlu0 %v1912_v1, %s1571_s2 }
 0x762   :  { %v639_v2 = vpop.permute.xlu0 %638 }
 0x763   :  { %642 = vst.msk [vmem:[#allocation3 + $0x8] sm:$0x3] %vm231_vm4, %v639_v2  ;;  %1480 = vmatmul.msk.f32.vlgmr.msrb.gmra.mxu0 %vm166_vm5, %v639_v2  ;;  %1481 = vmatmul.msk.f32.vlgmr.msrb.gmra.mxu1 %vm166_vm5, %v639_v2 }
 0x76a   :  { %v1212_v11 = vld [vmem:[#allocation3 + $0x8] sm:$0x3] }
 0x7e0   :  { %v701_v31 = vpop.f32.mrf.mxu0  ;;  %v721_v32 = vpop.f32.mrf.mxu1 }
 0x7e1   :  { %v702_v33 = vadd.f32 %v701_v31, %v678_v29  ;;  %v722_v34 = vadd.f32 %v721_v32, %v679_v30  ;;  %v871_v29 = vld [vmem:[%s2212_s3 + $0x78] sm:$0xff]  ;;  %v868_v30 = vld [vmem:[%s2212_s3 + $0x60] sm:$0xff]  ;;  %v869_v31 = vld [vmem:[%s2212_s3 + $0x68] sm:$0xff] }
 0x7e2   :  { %920 = vmatpush.msra.mxu1 %v871_v29  ;;  %v866_v32 = vld [vmem:[%s2212_s3 + $0x50] sm:$0xff]  ;;  %901 = vmatpush.msra.mxu0 %v868_v30 }
 0x7e3   :  { %v724_v35 = vmul.f32 0.5, %v702_v33  ;;  %v725_v36 = vmul.f32 %v722_v34, %v1809_v51  ;;  %v867_v33 = vld [vmem:[%s2212_s3 + $0x58] sm:$0xff]  ;;  %v864_v34 = vld [vmem:[%s2212_s3 + $0x40] sm:$0xff] }
 0x7e4   :  { %921 = vmatpush.msra.mxu1 %v869_v31  ;;  %902 = vmatpush.msra.mxu0 %v866_v32 }
 0x7e5   :  { %1551 = vtanh.f32 %v724_v35  ;;  %v865_v35 = vld [vmem:[%s2212_s3 + $0x48] sm:$0xff] }
 0x7e6   :  { %1553 = vtanh.f32 %v725_v36  ;;  %922 = vmatpush.msra.mxu1 %v867_v33  ;;  %903 = vmatpush.msra.mxu0 %v864_v34 }
 0x7e8   :  { %923 = vmatpush.msra.mxu1 %v865_v35 }
 0x7eb   :  { %v1552_v37 = vpop.eup %1551 }
 0x7ec   :  { %v1554_v38 = vpop.eup %1553  ;;  %v728_v39 = vmul.f32 0.5, %v1552_v37 }
 0x7ed   :  { %v729_v40 = vmul.f32 %v1554_v38, %v1809_v51  ;;  %v862_v38 = vld [vmem:[%s2212_s3 + $0x30] sm:$0xff] }
 0x7ee   :  { %v730_v41 = vadd.f32 0.5, %v728_v39  ;;  %v863_v39 = vld [vmem:[%s2212_s3 + $0x38] sm:$0xff]  ;;  %904 = vmatpush.msra.mxu0 %v862_v38 }
 0x7ef   :  { %v731_v43 = vadd.f32 %v729_v40, %v1815_v60  ;;  %v860_v40 = vld [vmem:[%s2212_s3 + $0x20] sm:$0xff]  ;;  %924 = vmatpush.msra.mxu1 %v863_v39 }
 0x7f0   :  { %v732_v45 = vmul.f32 %v730_v41, %v634_v63  ;;  %905 = vmatpush.msra.mxu0 %v860_v40 }
 0x7f1   :  { %v733_v44 = vmul.f32 %v731_v43, %v730_v41  ;;  %v861_v41 = vld [vmem:[%s2212_s3 + $0x28] sm:$0xff] }
 0x7f2   :  { %925 = vmatpush.msra.mxu1 %v861_v41 }
 0x7f3   :  { %735 = vrot.lane.b32.xlu1 %v733_v44, %s1571_s2  ;;  %v859_v44 = vld [vmem:[%s2212_s3 + $0x18] sm:$0xff] }
 0x7f4   :  { %926 = vmatpush.msra.mxu1 %v859_v44  ;;  %v1514_v44 = vld [vmem:[%s2216_s6] ss:$0 sm:$0xff] }
 0x865   :  { %v736_v46 = vpop.permute.xlu1 %735 }
 0x866   :  { %v1927_v48 = vadd.f32 %v736_v46, %v732_v45  ;;  %v856_v45 = vld [vmem:[%s2212_s3] sm:$0xff]  ;;  %v857_v46 = vld [vmem:[%s2212_s3 + $0x8] sm:$0xff] }
 0x867   :  { %927 = vmatpush.msra.mxu1 %v857_v46 }
 0x868   :  { %1555 = vtanh.f32 %v1927_v48 }
 0x869   :  { %1071 = vmatpush.msrb.mxu1 %v1937_v54 }
 0x86b   :  { %1072 = vmatpush.msrb.mxu1 %v1942_v5 }
 0x86d   :  { %1073 = vmatpush.msrb.mxu1 %v1948_v6 }
 0x86e   :  { %v1556_v49 = vpop.eup %1555 }
 0x86f   :  { %v1930_v50 = vmul.f32 %v1556_v49, %v731_v43  ;;  %v858_v43 = vld [vmem:[%s2212_s3 + $0x10] sm:$0xff]  ;;  %1074 = vmatpush.msrb.mxu1 %v1954_v7 }
 0x870   :  { %906 = vmatpush.msra.mxu0 %v858_v43  ;;  %v2054_v49 = vld [vmem:[%s2215_s5 + $0x10] sm:$0xff] }
 0x871   :  { %742 = vrot.lane.b32.xlu2 %v1930_v50, %s1571_s2 }
 0x872   :  { %907 = vmatpush.msra.mxu0 %v856_v45 }
 0x8cb   :  { %v743_v8 = vpop.permute.xlu2 %742 }
 0x8cc   :  { %746 = vst.msk [vmem:[#allocation3 + $0xa] sm:$0x3] %vm231_vm4, %v743_v8  ;;  %1482 = vmatmul.msk.f32.vlgmr.msrb.gmra.mxu2 %vm166_vm5, %v743_v8  ;;  %1483 = vmatmul.msk.f32.vlgmr.msrb.gmra.mxu3 %vm166_vm5, %v743_v8 }
 0x8cd   :  { %1134 = vmatpush.msrb.mxu3 %v1937_v54 }
 0x8cf   :  { %1135 = vmatpush.msrb.mxu3 %v1942_v5 }
 0x8d1   :  { %1136 = vmatpush.msrb.mxu3 %v1948_v6 }
 0x8d3   :  { %1137 = vmatpush.msrb.mxu3 %v1954_v7  ;;  %v1275_v17 = vld [vmem:[#allocation3 + $0xa] sm:$0x3] }
 0x8d4   :  { %1487 = vmatmul.msk.f32.vlgmr.msra.gmra.mxu3 %vm969_vm6, %v959_v9 }
 0x8d5   :  { %1260 = vmatpush.msra.mxu3 %v1937_v54 }
 0x8d7   :  { %1261 = vmatpush.msra.mxu3 %v1942_v5 }
 0x8d9   :  { %1262 = vmatpush.msra.mxu3 %v1948_v6 }
 0x8db   :  { %1263 = vmatpush.msra.mxu3 %v1954_v7 }
 0x8dc   :  { %1492 = vmatmul.msk.f32.vlgmr.msrb.gmra.mxu3 %vm969_vm6, %v1086_v10  ;;  %v1023_v10 = vld [vmem:[#allocation3 + $0x2] sm:$0x3] }
 0x8dd   :  { %1386 = vmatpush.msrb.mxu3 %v1937_v54 }
 0x8df   :  { %1387 = vmatpush.msrb.mxu3 %v1942_v5 }
 0x8e1   :  { %1388 = vmatpush.msrb.mxu3 %v1948_v6 }
 0x8e3   :  { %1389 = vmatpush.msrb.mxu3 %v1954_v7 }
 0x8e4   :  { %1498 = vmatmul.msk.f32.vlgmr.msra.gmra.mxu3 %vm969_vm6, %v1212_v11 }
 0x94f   :  { %v805_v56 = vpop.f32.mrf.mxu2  ;;  %v825_v57 = vpop.f32.mrf.mxu3 }
 0x950   :  { %v806_v58 = vadd.f32 %v805_v56, %v782_v21  ;;  %v826_v59 = vadd.f32 %v825_v57, %v783_v55  ;;  %v879_v21 = vrot.slane %v875_v18, 2 }
 0x952   :  { %v828_v61 = vmul.f32 0.5, %v806_v58  ;;  %v829_v62 = vmul.f32 %v826_v59, %v1809_v51 }
 0x954   :  { %1557 = vtanh.f32 %v828_v61 }
 0x955   :  { %1559 = vtanh.f32 %v829_v62 }
 0x957   :  { %v1013_v43 = vpop.f32.mrf.mxu3 }
 0x95a   :  { %v1558_v63 = vpop.eup %1557 }
 0x95b   :  { %v1560_v0 = vpop.eup %1559  ;;  %v832_v2 = vmul.f32 0.5, %v1558_v63 }
 0x95c   :  { %v833_v4 = vmul.f32 %v1560_v0, %v1809_v51 }
 0x95d   :  { %v834_v22 = vadd.f32 0.5, %v832_v2 }
 0x95e   :  { %v835_v23 = vadd.f32 %v833_v4, %v1815_v60 }
 0x95f   :  { %v836_v25 = vmul.f32 %v834_v22, %v1927_v48  ;;  %v2049_v48 = vld [vmem:[%s2215_s5 + $0x18] sm:$0xff] }
 0x960   :  { %v837_v24 = vmul.f32 %v835_v23, %v834_v22  ;;  %1048 = vmatpush.msrb.mxu0 %v2049_v48  ;;  %985 = vmatpush.msra.mxu2 %v2049_v48 }
 0x962   :  { %839 = vrot.lane.b32.xlu0 %v837_v24, %s1571_s2  ;;  %1049 = vmatpush.msrb.mxu0 %v2054_v49 }
 0x963   :  { %986 = vmatpush.msra.mxu2 %v2054_v49 }
 0x9d4   :  { %v840_v26 = vpop.permute.xlu0 %839 }
 0x9d5   :  { %v1985_v27 = vadd.f32 %v840_v26, %v836_v25 }
 0x9d7   :  { %1561 = vtanh.f32 %v1985_v27 }
 0x9dd   :  { %v1562_v36 = vpop.eup %1561 }
 0x9de   :  { %v844_v37 = vmul.f32 %v1562_v36, %v835_v23 }
 0x9e0   :  { %846 = vrot.lane.b32.xlu1 %v844_v37, %s1571_s2 }
 0x9e8   :  { %851 = vrot.lane.b32.xlu1 %v844_v37, %s1572_s0 }
 0x9f0   :  { %545 = vrot.lane.b32.xlu1 %v1897_v52, %s1572_s0  ;;  %v2061_v52 = vld [vmem:[%s2215_s5 + $0x8] sm:$0xff] }
 0x9f1   :  { %1050 = vmatpush.msrb.mxu0 %v2061_v52  ;;  %987 = vmatpush.msra.mxu2 %v2061_v52 }
 0x9f8   :  { %233 = vrot.lane.b32.xlu1 %v1820_v14, %s1572_s0  ;;  %v2068_v14 = vld [vmem:[%s2215_s5] sm:$0xff] }
 0x9f9   :  { %1051 = vmatpush.msrb.mxu0 %v2068_v14  ;;  %988 = vmatpush.msra.mxu2 %v2068_v14 }
 0x9fb   :  { %1111 = vmatpush.msrb.mxu2 %v2049_v48 }
 0x9fd   :  { %1112 = vmatpush.msrb.mxu2 %v2054_v49 }
 0x9ff   :  { %1113 = vmatpush.msrb.mxu2 %v2061_v52 }
 0xa01   :  { %1114 = vmatpush.msrb.mxu2 %v2068_v14 }
 0xa52   :  { %v847_v8 = vpop.permute.xlu1 %846 }
 0xa53   :  { %850 = vst.msk [vmem:[#allocation3 + $0xc] sm:$0x3] %vm231_vm4, %v847_v8  ;;  %1484 = vmatmul.msk.f32.vlgmr.msra.gmra.mxu0 %vm166_vm5, %v847_v8  ;;  %1485 = vmatmul.msk.f32.vlgmr.msra.gmra.mxu1 %vm166_vm5, %v847_v8 }
 0xa54   :  { %1197 = vmatpush.msra.mxu1 %v1937_v54  ;;  %1174 = vmatpush.msra.mxu0 %v2049_v48 }
 0xa56   :  { %1198 = vmatpush.msra.mxu1 %v1942_v5  ;;  %1175 = vmatpush.msra.mxu0 %v2054_v49 }
 0xa58   :  { %1199 = vmatpush.msra.mxu1 %v1948_v6  ;;  %1176 = vmatpush.msra.mxu0 %v2061_v52 }
 0xa5a   :  { %v852_v9 = vpop.permute.xlu1 %851  ;;  %v1338_v11 = vld [vmem:[#allocation3 + $0xc] sm:$0x3]  ;;  %1200 = vmatpush.msra.mxu1 %v1954_v7  ;;  %1177 = vmatpush.msra.mxu0 %v2068_v14 }
 0xa5b   :  { %855 = vst.msk [vmem:[#allocation4 + $0x2] sm:$0x3] %vm231_vm4, %v852_v9  ;;  %1489 = vmatmul.msk.f32.vlgmr.msrb.gmra.mxu1 %vm969_vm6, %v1023_v10  ;;  %1504 = vmatmul.msk.f32.vlgmr.msrb.gmra.mxu3 %vm969_vm6, %v1338_v11  ;;  %v1139_v10 = vpop.f32.mrf.mxu3  ;;  %v1516_v11 = vld [vmem:[%s2216_s6] ss:$0 sm:$0xff] }
 0xa5c   :  { %1323 = vmatpush.msrb.mxu1 %v1937_v54 }
 0xa5e   :  { %1324 = vmatpush.msrb.mxu1 %v1942_v5 }
 0xa60   :  { %1325 = vmatpush.msrb.mxu1 %v1948_v6 }
 0xa62   :  { %v546_v12 = vpop.permute.xlu1 %545  ;;  %v1028_v13 = vld [vmem:[#allocation4 + $0x2] sm:$0x3]  ;;  %1326 = vmatpush.msrb.mxu1 %v1954_v7 }
 0xa63   :  { %549 = vst.msk [vmem:[#allocation4 + $0x8] sm:$0x3] %vm231_vm4, %v546_v12  ;;  %1488 = vmatmul.msk.f32.vlgmr.msrb.gmra.mxu0 %vm969_vm6, %v1028_v13  ;;  %1495 = vmatmul.msk.f32.vlgmr.msra.gmra.mxu1 %vm969_vm6, %v1149_v15  ;;  %v1517_v15 = vld [vmem:[%s2216_s6] ss:$0 sm:$0xff] }
 0xa64   :  { %1449 = vmatpush.msra.mxu1 %v1937_v54  ;;  %1300 = vmatpush.msrb.mxu0 %v2049_v48  ;;  %v874_v54 = vld [vmem:[#allocation2 + $0x10] sm:$0x3] }
 0xa65   :  { %v878_v20 = vrot.slane %v874_v54, 2 }
 0xa66   :  { %1450 = vmatpush.msra.mxu1 %v1942_v5  ;;  %1301 = vmatpush.msrb.mxu0 %v2054_v49  ;;  %v873_v5 = vld [vmem:[#allocation2 + $0x8] sm:$0xc0] }
 0xa67   :  { %v883_v55 = vsel %vm1804_vm3, %v873_v5, %v879_v21  ;;  %v1518_v5 = vld [vmem:[%s2216_s6] ss:$0 sm:$0xff] }
 0xa68   :  { %1451 = vmatpush.msra.mxu1 %v1948_v6  ;;  %1302 = vmatpush.msrb.mxu0 %v2061_v52  ;;  %v882_v6 = vsel %vm1798_vm2, %v872_v19, %v878_v20  ;;  %v1265_v20 = vpop.f32.mrf.mxu3 }
 0xa69   :  { %v886_v56 = vrot.slane %v882_v6, 6 }
 0xa6a   :  { %v234_v16 = vpop.permute.xlu1 %233  ;;  %1452 = vmatpush.msra.mxu1 %v1954_v7  ;;  %1303 = vmatpush.msrb.mxu0 %v2068_v14  ;;  %v887_v7 = vrot.slane %v883_v55, 6  ;;  %v1217_v38 = vld [vmem:[#allocation4 + $0x8] sm:$0x3]  ;;  %v1519_v55 = vld [vmem:[%s2216_s6] ss:$0 sm:$0xff] }
 0xa6b   :  { %237 = vst.msk [vmem:[#allocation4 + $0xe] sm:$0x3] %vm231_vm4, %v234_v16  ;;  %1501 = vmatmul.msk.f32.vlgmr.msrb.gmra.mxu1 %vm969_vm6, %v1275_v17 }
 0xa72   :  { %v1406_v41 = vld [vmem:[#allocation4 + $0xe] sm:$0x3] }
 0xad0   :  { %v909_v57 = vpop.f32.mrf.mxu0  ;;  %v929_v58 = vpop.f32.mrf.mxu1 }
 0xad1   :  { %v910_v59 = vadd.f32 %v909_v57, %v886_v56  ;;  %v930_v61 = vadd.f32 %v929_v58, %v887_v7 }
 0xad3   :  { %v932_v62 = vmul.f32 0.5, %v910_v59  ;;  %v933_v63 = vmul.f32 %v930_v61, %v1809_v51  ;;  %v1520_v61 = vld [vmem:[%s2216_s6] ss:$0 sm:$0xff] }
 0xad5   :  { %1563 = vtanh.f32 %v932_v62 }
 0xad6   :  { %1565 = vtanh.f32 %v933_v63 }
 0xad8   :  { %v1076_v24 = vpop.f32.mrf.mxu1 }
 0xadb   :  { %v1564_v0 = vpop.eup %1563 }
 0xadc   :  { %v1566_v2 = vpop.eup %1565  ;;  %v936_v4 = vmul.f32 0.5, %v1564_v0 }
 0xadd   :  { %v937_v42 = vmul.f32 %v1566_v2, %v1809_v51 }
 0xade   :  { %v938_v22 = vadd.f32 0.5, %v936_v4  ;;  %v1391_v62 = vpop.f32.mrf.mxu3 }
 0xadf   :  { %v939_v23 = vadd.f32 %v937_v42, %v1815_v60 }
 0xae0   :  { %v1053_v25 = vpop.f32.mrf.mxu0  ;;  %v940_v51 = vmul.f32 %v938_v22, %v1985_v27  ;;  %v1202_v45 = vpop.f32.mrf.mxu1 }
 0xae1   :  { %v1077_v26 = vadd.f32 %v1076_v24, %v1053_v25  ;;  %v941_v28 = vmul.f32 %v939_v23, %v938_v22 }
 0xae3   :  { %v1083_v29 = vadd.f32 %v1513_v47, %v1077_v26  ;;  %943 = vrot.lane.b32.xlu2 %v941_v28, %s1571_s2 }
 0xae5   :  { %1490 = vst.msk [vmem:[%s2217_s7 + $0x2] sm:$0x3] %vm1021_vm7, %v1083_v29 }
 0xae8   :  { %v1328_v16 = vpop.f32.mrf.mxu1 }
 0xaeb   :  { %747 = vrot.lane.b32.xlu2 %v1930_v50, %s1572_s0 }
 0xaf3   :  { %441 = vrot.lane.b32.xlu2 %v1882_v3, %s1572_s0 }
 0xb3d   :  { %v944_v60 = vpop.permute.xlu2 %943 }
 0xb3e   :  { %v946_v30 = vadd.f32 %v944_v60, %v940_v51 }
 0xb40   :  { %1567 = vtanh.f32 %v946_v30 }
 0xb45   :  { %v748_v31 = vpop.permute.xlu2 %747 }
 0xb46   :  { %v1568_v32 = vpop.eup %1567  ;;  %751 = vst.msk [vmem:[#allocation4 + $0x4] sm:$0x3] %vm231_vm4, %v748_v31 }
 0xb47   :  { %v948_v33 = vmul.f32 %v1568_v32, %v939_v23 }
 0xb49   :  { %950 = vrot.lane.b32.xlu2 %v948_v33, %s1571_s2  ;;  %955 = vrot.lane.b32.xlu0 %v948_v33, %s1572_s0 }
 0xb4d   :  { %v442_v34 = vpop.permute.xlu2 %441 }
 0xb4e   :  { %445 = vst.msk [vmem:[#allocation4 + $0xa] sm:$0x3] %vm231_vm4, %v442_v34 }
 0xb51   :  { %643 = vrot.lane.b32.xlu0 %v1912_v1, %s1572_s0  ;;  %v1091_v1 = vld [vmem:[#allocation4 + $0x4] sm:$0x3] }
 0xb55   :  { %v1280_v39 = vld [vmem:[#allocation4 + $0xa] sm:$0x3] }
 0xb59   :  { %337 = vrot.lane.b32.xlu0 %v1851_v53, %s1572_s0 }
 0xba3   :  { %v951_v3 = vpop.permute.xlu2 %950 }
 0xba4   :  { %954 = vst.msk [vmem:[#allocation3 + $0xe] sm:$0x3] %vm231_vm4, %v951_v3 }
 0xbab   :  { %v1401_v50 = vld [vmem:[#allocation3 + $0xe] sm:$0x3] }
 0xbac   :  { %1507 = vmatmul.msk.f32.vlgmr.msra.gmra.mxu1 %vm969_vm6, %v1401_v50 }
 0xbbb   :  { %v956_v27 = vpop.permute.xlu0 %955 }
 0xbbc   :  { %958 = vst.msk [vmem:[#allocation4] sm:$0x3] %vm231_vm4, %v956_v27 }
 0xbc3   :  { %v644_v35 = vpop.permute.xlu0 %643  ;;  %v964_v36 = vld [vmem:[#allocation4] sm:$0x3] }
 0xbc4   :  { %647 = vst.msk [vmem:[#allocation4 + $0x6] sm:$0x3] %vm231_vm4, %v644_v35  ;;  %1486 = vmatmul.msk.f32.vlgmr.msra.gmra.mxu2 %vm969_vm6, %v964_v36 }
 0xbc5   :  { %1237 = vmatpush.msra.mxu2 %v2049_v48 }
 0xbc7   :  { %1238 = vmatpush.msra.mxu2 %v2054_v49 }
 0xbc9   :  { %1239 = vmatpush.msra.mxu2 %v2061_v52 }
 0xbcb   :  { %v338_v53 = vpop.permute.xlu0 %337  ;;  %v1154_v37 = vld [vmem:[#allocation4 + $0x6] sm:$0x3]  ;;  %1240 = vmatpush.msra.mxu2 %v2068_v14 }
 0xbcc   :  { %341 = vst.msk [vmem:[#allocation4 + $0xc] sm:$0x3] %vm231_vm4, %v338_v53  ;;  %1491 = vmatmul.msk.f32.vlgmr.msrb.gmra.mxu2 %vm969_vm6, %v1091_v1  ;;  %1494 = vmatmul.msk.f32.vlgmr.msra.gmra.mxu0 %vm969_vm6, %v1154_v37 }
 0xbcd   :  { %1363 = vmatpush.msrb.mxu2 %v2049_v48  ;;  %1426 = vmatpush.msra.mxu0 %v2049_v48 }
 0xbcf   :  { %1364 = vmatpush.msrb.mxu2 %v2054_v49  ;;  %1427 = vmatpush.msra.mxu0 %v2054_v49  ;;  %v1515_v49 = vld [vmem:[%s2216_s6] ss:$0 sm:$0xff] }
 0xbd1   :  { %1365 = vmatpush.msrb.mxu2 %v2061_v52  ;;  %1428 = vmatpush.msra.mxu0 %v2061_v52 }
 0xbd3   :  { %1366 = vmatpush.msrb.mxu2 %v2068_v14  ;;  %1429 = vmatpush.msra.mxu0 %v2068_v14  ;;  %v1343_v40 = vld [vmem:[#allocation4 + $0xc] sm:$0x3] }
 0xbd4   :  { %1497 = vmatmul.msk.f32.vlgmr.msra.gmra.mxu2 %vm969_vm6, %v1217_v38  ;;  %1500 = vmatmul.msk.f32.vlgmr.msrb.gmra.mxu0 %vm969_vm6, %v1280_v39 }
 0xbdc   :  { %1503 = vmatmul.msk.f32.vlgmr.msrb.gmra.mxu2 %vm969_vm6, %v1343_v40  ;;  %1506 = vmatmul.msk.f32.vlgmr.msra.gmra.mxu0 %vm969_vm6, %v1406_v41 }
 0xc29   :  { %v1454_v56 = vpop.f32.mrf.mxu1 }
 0xc47   :  { %v990_v46 = vpop.f32.mrf.mxu2 }
 0xc48   :  { %v1014_v48 = vadd.f32 %v1013_v43, %v990_v46 }
 0xc49   :  { %v1179_v52 = vpop.f32.mrf.mxu0 }
 0xc4a   :  { %v1020_v14 = vadd.f32 %v1514_v44, %v1014_v48  ;;  %v1203_v8 = vadd.f32 %v1202_v45, %v1179_v52 }
 0xc4c   :  { %1022 = vst.msk [vmem:[%s2217_s7] sm:$0x3] %vm1021_vm7, %v1020_v14  ;;  %v1209_v9 = vadd.f32 %v1515_v49, %v1203_v8 }
 0xc4e   :  { %1496 = vst.msk [vmem:[%s2217_s7 + $0x6] sm:$0x3] %vm1021_vm7, %v1209_v9 }
 0xc4f   :  { %v1116_v12 = vpop.f32.mrf.mxu2 }
 0xc50   :  { %v1140_v13 = vadd.f32 %v1139_v10, %v1116_v12 }
 0xc51   :  { %v1305_v17 = vpop.f32.mrf.mxu0 }
 0xc52   :  { %v1146_v54 = vadd.f32 %v1516_v11, %v1140_v13  ;;  %v1329_v18 = vadd.f32 %v1328_v16, %v1305_v17 }
 0xc54   :  { %1493 = vst.msk [vmem:[%s2217_s7 + $0x4] sm:$0x3] %vm1021_vm7, %v1146_v54  ;;  %v1335_v19 = vadd.f32 %v1517_v15, %v1329_v18 }
 0xc56   :  { %1502 = vst.msk [vmem:[%s2217_s7 + $0xa] sm:$0x3] %vm1021_vm7, %v1335_v19 }
 0xc57   :  { %v1242_v21 = vpop.f32.mrf.mxu2 }
 0xc58   :  { %v1266_v6 = vadd.f32 %v1265_v20, %v1242_v21 }
 0xc59   :  { %v1431_v7 = vpop.f32.mrf.mxu0 }
 0xc5a   :  { %v1272_v57 = vadd.f32 %v1518_v5, %v1266_v6  ;;  %v1455_v58 = vadd.f32 %v1454_v56, %v1431_v7 }
 0xc5c   :  { %1499 = vst.msk [vmem:[%s2217_s7 + $0x8] sm:$0x3] %vm1021_vm7, %v1272_v57  ;;  %v1461_v59 = vadd.f32 %v1519_v55, %v1455_v58 }
 0xc5e   :  { %1508 = vst.msk [vmem:[%s2217_s7 + $0xe] sm:$0x3] %vm1021_vm7, %v1461_v59 }
 0xc5f   :  { %v1368_v63 = vpop.f32.mrf.mxu2 }
 0xc60   :  { %v1392_v0 = vadd.f32 %v1391_v62, %v1368_v63 }
 0xc62   :  { %v1398_v2 = vadd.f32 %v1520_v61, %v1392_v0 }
 0xc64   :  { %1505 = vst.msk [vmem:[%s2217_s7 + $0xc] sm:$0x3] %vm1021_vm7, %v1398_v2 }

</bundles_post_ra>
